<compile_context>
chip_gen: v7x
topology: tpu7x:2x2x1
jax: 0.10.0
libtpu: 0.0.40
codegen_flags: <defaults>
</compile_context>

<pallas_src>
import functools

import jax
import jax.numpy as jnp
from jax.experimental import pallas as pl
from jax.experimental.pallas import tpu as pltpu

SUBLANE = 8          # pad batch to a sublane multiple
LANE = 128           # pad merged-FC output width to a lane multiple
RECURRENT_MXU_DTYPE = jnp.bfloat16   # h @ W_hh operand dtype (f32 accumulate)


# ----------------------------------------------------------------------------
# Single fused kernel: multi-layer LSTM recurrence + merged, lane-padded FC.
# Gate order matches PyTorch nn.LSTM: [i, f, g, o].
# ----------------------------------------------------------------------------
def fused_lstm_kernel(*refs, num_layers, seq_len, batch_pad, hidden_size):
    """Ref layout (positional):
      refs[0]                 x        (S, Bp, in0)   time-major, batch-padded
      refs[1 + 3*l + 0]       w_ih_l^T (in_l, 4H)     f32
      refs[1 + 3*l + 1]       w_hh_l^T (H, 4H)        RECURRENT_MXU_DTYPE
      refs[1 + 3*l + 2]       b_l      (1, 4H)        f32 (= b_ih + b_hh)
      refs[1 + 3*L + 0]       fc_w     (H, LANEpad)   three heads, zero-padded
      refs[1 + 3*L + 1]       fc_b     (1, LANEpad)
      refs[1 + 3*L + 2]       h0       (L, Bp, H)
      refs[1 + 3*L + 3]       c0       (L, Bp, H)
      refs[1 + 3*L + 4]       out      (Bp, LANEpad)
      refs[1 + 3*L + 5]       gx_scr   (S*Bp, 4H)     VMEM scratch
      refs[1 + 3*L + 6]       h_scr    (S*Bp, H)      VMEM scratch
    """
    S, H, L, Bp = seq_len, hidden_size, num_layers, batch_pad
    x_ref = refs[0]
    layer_refs = refs[1:1 + 3 * L]
    fcw_ref, fcb_ref, h0_ref, c0_ref, out_ref, gx_scr, h_scr = refs[1 + 3 * L:]

    # ---- layer-0 input projection for all timesteps (off the serial chain) --
    wih0 = layer_refs[0][...]                      # (in0, 4H) f32
    b0 = layer_refs[2][...]                        # (1, 4H)
    for t in range(S):
        x_t = x_ref[t]                             # (Bp, in0)
        gx_scr[t * Bp:(t + 1) * Bp, :] = (
            jnp.dot(x_t, wih0, preferred_element_type=jnp.float32) + b0)

    # ---- recurrence ---------------------------------------------------------
    h = None
    for l in range(L):
        whh = layer_refs[3 * l + 1][...]           # (H, 4H) bf16 (or f32)
        has_next = (l + 1) < L
        h = h0_ref[l]                              # (Bp, H) f32
        c = c0_ref[l]                              # (Bp, H) f32

        # Fully unrolled time loop (static trip count S).  Only work on the
        # serial h->c->h chain: one (Bp,H)@(H,4H) matmul (fused with the gx
        # add), 2 EUP passes over the full 128-lane gate vector, tanh(c), FMAs.
        for t in range(S):
            gx_t = gx_scr[t * Bp:(t + 1) * Bp, :]  # aligned whole-vreg load
            gates = gx_t + jnp.dot(h.astype(whh.dtype), whh,
                                   preferred_element_type=jnp.float32)
            sig = jax.nn.sigmoid(gates)            # covers i, f, o in one pass
            th = jnp.tanh(gates)                   # covers g in one pass
            i_g = sig[:, 0 * H:1 * H]
            f_g = sig[:, 1 * H:2 * H]
            g_g = th[:, 2 * H:3 * H]
            o_g = sig[:, 3 * H:4 * H]
            c = f_g * c + i_g * g_g
            h = o_g * jnp.tanh(c)
            if has_next:
                # Stash h_t; the next layer's input projection is batched
                # below (one big matmul, off the critical chain).
                h_scr[t * Bp:(t + 1) * Bp, :] = h

        if has_next:
            wih_n = layer_refs[3 * (l + 1)][...]       # (H, 4H) f32
            b_n = layer_refs[3 * (l + 1) + 2][...]     # (1, 4H)
            gx_scr[...] = (jnp.dot(h_scr[...], wih_n,
                                   preferred_element_type=jnp.float32) + b_n)

    # ---- three Linear heads merged + lane-padded: unmasked full-vreg store --
    out_ref[...] = (jnp.dot(h, fcw_ref[...], preferred_element_type=jnp.float32)
                    + fcb_ref[...])


# ----------------------------------------------------------------------------
# One-time parameter prep (hoisted out of the per-call forward).
# ----------------------------------------------------------------------------
def prepare_params(lstm_params, fc_w, fc_b):
    """lstm_params: list of (w_ih, w_hh, b_ih, b_hh) per layer (PyTorch layout).
       fc_w: (n_heads, H, O) already-transposed Linear weights; fc_b: (n_heads, 1, O).
       Returns (flat_lstm_weights, fc_w_pad, fc_b_pad)."""
    flat = []
    for (w_ih, w_hh, b_ih, b_hh) in lstm_params:
        flat.append(jnp.asarray(w_ih.T, jnp.float32))              # (in, 4H)
        flat.append(jnp.asarray(w_hh.T, RECURRENT_MXU_DTYPE))      # (H, 4H)
        flat.append((b_ih + b_hh).reshape(1, -1).astype(jnp.float32))
    n_heads, H, O = fc_w.shape
    ow = n_heads * O
    ow_pad = max(LANE, pl.cdiv(ow, LANE) * LANE)
    fc_w_cat = jnp.transpose(fc_w, (1, 0, 2)).reshape(H, ow)       # (H, 3O)
    fc_b_cat = fc_b.reshape(1, ow)                                  # (1, 3O)
    fc_w_pad = jnp.zeros((H, ow_pad), jnp.float32).at[:, :ow].set(fc_w_cat)
    fc_b_pad = jnp.zeros((1, ow_pad), jnp.float32).at[:, :ow].set(fc_b_cat)
    return tuple(flat), fc_w_pad, fc_b_pad


# ----------------------------------------------------------------------------
# Forward: one pallas_call; only per-call layout work is x transpose + B-pad.
# ----------------------------------------------------------------------------
def lstm_model_forward(x_bsf, flat_weights, fc_w_pad, fc_b_pad, h0, c0, *,
                       n_heads, output_size):
    """
    x_bsf: (B, S, input_size) batch-first (like PyTorch batch_first=True).
    h0, c0: (num_layers, B, H).
    Returns pred: (n_heads, B, O) — matches torch.stack([p1,p2,p3], dim=0).
    """
    B, S, _ = x_bsf.shape
    L, _, H = h0.shape
    Bp = pl.cdiv(B, SUBLANE) * SUBLANE
    ow_pad = fc_w_pad.shape[1]

    # Time-major + batch padded to a sublane multiple (padding rows are zero
    # and never read back — batch rows are independent end to end).
    x_tm = jnp.transpose(x_bsf, (1, 0, 2))                     # (S, B, I)
    if Bp != B:
        padb = ((0, 0), (0, Bp - B), (0, 0))
        x_tm = jnp.pad(x_tm, padb)
        h0 = jnp.pad(h0, padb)
        c0 = jnp.pad(c0, padb)

    kernel = functools.partial(fused_lstm_kernel, num_layers=L, seq_len=S,
                               batch_pad=Bp, hidden_size=H)
    pred_pad = pl.pallas_call(
        kernel,
        out_shape=jax.ShapeDtypeStruct((Bp, ow_pad), jnp.float32),
        scratch_shapes=[pltpu.VMEM((S * Bp, 4 * H), jnp.float32),   # gx
                        pltpu.VMEM((S * Bp, H), jnp.float32)],      # stored h_t
    )(x_tm, *flat_weights, fc_w_pad, fc_b_pad, h0, c0)

    # (Bp, LANEpad) -> (n_heads, B, O), matching torch.stack([...], dim=0).
    pred = pred_pad[:B, :n_heads * output_size]
    return jnp.transpose(pred.reshape(B, n_heads, output_size), (1, 0, 2))


# ----------------------------------------------------------------------------
# Deterministic parameter construction (PyTorch-style uniform(-1/sqrt(H), ..)).
# ----------------------------------------------------------------------------
def init_params(key, input_size, hidden_size, num_layers, output_size,
                n_outputs=3):
    H = hidden_size
    bound = 1.0 / jnp.sqrt(jnp.float32(H))
    lstm_params = []
    for l in range(num_layers):
        in_dim = input_size if l == 0 else H
        key, k1, k2, k3, k4 = jax.random.split(key, 5)
        w_ih = jax.random.uniform(k1, (4 * H, in_dim), jnp.float32, -bound, bound)
        w_hh = jax.random.uniform(k2, (4 * H, H), jnp.float32, -bound, bound)
        b_ih = jax.random.uniform(k3, (4 * H,), jnp.float32, -bound, bound)
        b_hh = jax.random.uniform(k4, (4 * H,), jnp.float32, -bound, bound)
        lstm_params.append((w_ih, w_hh, b_ih, b_hh))

    fc_ws, fc_bs = [], []
    for _ in range(n_outputs):
        key, kw, kb = jax.random.split(key, 3)
        # PyTorch Linear weight is (O, H); store transposed (H, O).
        w = jax.random.uniform(kw, (H, output_size), jnp.float32, -bound, bound)
        b = jax.random.uniform(kb, (1, output_size), jnp.float32, -bound, bound)
        fc_ws.append(w)
        fc_bs.append(b)
    fc_w = jnp.stack(fc_ws, axis=0)          # (n_outputs, H, O)
    fc_b = jnp.stack(fc_bs, axis=0)          # (n_outputs, 1, O)
    return lstm_params, fc_w, fc_b, key


if __name__ == "__main__":
    # Small shapes consistent with the module's forward pass.
    input_size = 4
    hidden_size = 32
    num_layers = 2
    output_size = 1
    batch_size = 2
    seq_len = 8
    n_outputs = 3

    key = jax.random.PRNGKey(0)
    lstm_params, fc_w, fc_b, key = init_params(
        key, input_size, hidden_size, num_layers, output_size, n_outputs)

    # One-time layout prep (weight transposes, bias fold, FC merge/pad).
    flat_weights, fc_w_pad, fc_b_pad = prepare_params(lstm_params, fc_w, fc_b)

    key, kx, kh, kc = jax.random.split(key, 4)
    x = jax.random.normal(kx, (batch_size, seq_len, input_size), jnp.float32)
    # PyTorch uses torch.randn initial states per call; deterministic here.
    h0 = jax.random.normal(kh, (num_layers, batch_size, hidden_size), jnp.float32)
    c0 = jax.random.normal(kc, (num_layers, batch_size, hidden_size), jnp.float32)

    forward = jax.jit(functools.partial(
        lstm_model_forward, n_heads=n_outputs, output_size=output_size))
    pred = forward(x, flat_weights, fc_w_pad, fc_b_pad, h0, c0)
    pred = jax.block_until_ready(pred)

    assert pred.shape == (n_outputs, batch_size, output_size), pred.shape
    assert pred.dtype == jnp.float32
    print("KERNEL_OK")
</pallas_src>

<mosaic_0001>
module attributes {stable_mosaic.version = 11 : i64} {
  func.func @fused_lstm_kernel(%arg0: memref<8x8x4xf32, #tpu.memory_space<vmem>>, %arg1: memref<4x128xf32, #tpu.memory_space<vmem>>, %arg2: memref<32x128xbf16, #tpu.memory_space<vmem>>, %arg3: memref<1x128xf32, #tpu.memory_space<vmem>>, %arg4: memref<32x128xf32, #tpu.memory_space<vmem>>, %arg5: memref<32x128xbf16, #tpu.memory_space<vmem>>, %arg6: memref<1x128xf32, #tpu.memory_space<vmem>>, %arg7: memref<32x128xf32, #tpu.memory_space<vmem>>, %arg8: memref<1x128xf32, #tpu.memory_space<vmem>>, %arg9: memref<2x8x32xf32, #tpu.memory_space<vmem>>, %arg10: memref<2x8x32xf32, #tpu.memory_space<vmem>>, %arg11: memref<8x128xf32, #tpu.memory_space<vmem>>, %arg12: memref<64x128xf32, #tpu.memory_space<vmem>>, %arg13: memref<64x32xf32, #tpu.memory_space<vmem>>) attributes {dimension_semantics = [], scalar_prefetch = 0 : i64, scratch_operands = 2 : i64, tpu.core_type = #tpu.core_type<tc>} {
    %c0 = arith.constant 0 : index
    %c0_0 = arith.constant 0 : index
    %0 = vector.load %arg1[%c0, %c0_0] : memref<4x128xf32, #tpu.memory_space<vmem>>, vector<4x128xf32>
    %c0_1 = arith.constant 0 : index
    %c0_2 = arith.constant 0 : index
    %1 = vector.load %arg3[%c0_1, %c0_2] : memref<1x128xf32, #tpu.memory_space<vmem>>, vector<1x128xf32>
    %c0_3 = arith.constant 0 : index
    %c0_4 = arith.constant 0 : index
    %c0_5 = arith.constant 0 : index
    %2 = vector.load %arg0[%c0_3, %c0_4, %c0_5] : memref<8x8x4xf32, #tpu.memory_space<vmem>>, vector<1x8x4xf32>
    %3 = vector.shape_cast %2 : vector<1x8x4xf32> to vector<8x4xf32>
    %cst = arith.constant dense<0.000000e+00> : vector<8x128xf32>
    %4 = tpu.matmul %3, %0, %cst {dimension_numbers = #tpu.dot_dimension_numbers<[1], [0], [0], [1], [0, 0, 1, 1], [], []>} : vector<8x4xf32>, vector<4x128xf32>, vector<8x128xf32> -> vector<8x128xf32>
    %5 = vector.broadcast %1 : vector<1x128xf32> to vector<8x128xf32>
    %6 = arith.addf %4, %5 : vector<8x128xf32>
    %c0_6 = arith.constant 0 : index
    %c0_7 = arith.constant 0 : index
    %7 = vector.load %arg12[%c0_6, %c0_7] : memref<64x128xf32, #tpu.memory_space<vmem>>, vector<8x128xf32>
    tpu.vector_store %arg12[%c0_6, %c0_7], %6 {strides = array<i32>} : memref<64x128xf32, #tpu.memory_space<vmem>>, vector<8x128xf32>,
    %c1 = arith.constant 1 : index
    %c0_8 = arith.constant 0 : index
    %c0_9 = arith.constant 0 : index
    %8 = vector.load %arg0[%c1, %c0_8, %c0_9] : memref<8x8x4xf32, #tpu.memory_space<vmem>>, vector<1x8x4xf32>
    %9 = vector.shape_cast %8 : vector<1x8x4xf32> to vector<8x4xf32>
    %cst_10 = arith.constant dense<0.000000e+00> : vector<8x128xf32>
    %10 = tpu.matmul %9, %0, %cst_10 {dimension_numbers = #tpu.dot_dimension_numbers<[1], [0], [0], [1], [0, 0, 1, 1], [], []>} : vector<8x4xf32>, vector<4x128xf32>, vector<8x128xf32> -> vector<8x128xf32>
    %11 = vector.broadcast %1 : vector<1x128xf32> to vector<8x128xf32>
    %12 = arith.addf %10, %11 : vector<8x128xf32>
    %c8 = arith.constant 8 : index
    %c0_11 = arith.constant 0 : index
    %13 = vector.load %arg12[%c8, %c0_11] : memref<64x128xf32, #tpu.memory_space<vmem>>, vector<8x128xf32>
    tpu.vector_store %arg12[%c8, %c0_11], %12 {strides = array<i32>} : memref<64x128xf32, #tpu.memory_space<vmem>>, vector<8x128xf32>,
    %c2 = arith.constant 2 : index
    %c0_12 = arith.constant 0 : index
    %c0_13 = arith.constant 0 : index
    %14 = vector.load %arg0[%c2, %c0_12, %c0_13] : memref<8x8x4xf32, #tpu.memory_space<vmem>>, vector<1x8x4xf32>
    %15 = vector.shape_cast %14 : vector<1x8x4xf32> to vector<8x4xf32>
    %cst_14 = arith.constant dense<0.000000e+00> : vector<8x128xf32>
    %16 = tpu.matmul %15, %0, %cst_14 {dimension_numbers = #tpu.dot_dimension_numbers<[1], [0], [0], [1], [0, 0, 1, 1], [], []>} : vector<8x4xf32>, vector<4x128xf32>, vector<8x128xf32> -> vector<8x128xf32>
    %17 = vector.broadcast %1 : vector<1x128xf32> to vector<8x128xf32>
    %18 = arith.addf %16, %17 : vector<8x128xf32>
    %c16 = arith.constant 16 : index
    %c0_15 = arith.constant 0 : index
    %19 = vector.load %arg12[%c16, %c0_15] : memref<64x128xf32, #tpu.memory_space<vmem>>, vector<8x128xf32>
    tpu.vector_store %arg12[%c16, %c0_15], %18 {strides = array<i32>} : memref<64x128xf32, #tpu.memory_space<vmem>>, vector<8x128xf32>,
    %c3 = arith.constant 3 : index
    %c0_16 = arith.constant 0 : index
    %c0_17 = arith.constant 0 : index
    %20 = vector.load %arg0[%c3, %c0_16, %c0_17] : memref<8x8x4xf32, #tpu.memory_space<vmem>>, vector<1x8x4xf32>
    %21 = vector.shape_cast %20 : vector<1x8x4xf32> to vector<8x4xf32>
    %cst_18 = arith.constant dense<0.000000e+00> : vector<8x128xf32>
    %22 = tpu.matmul %21, %0, %cst_18 {dimension_numbers = #tpu.dot_dimension_numbers<[1], [0], [0], [1], [0, 0, 1, 1], [], []>} : vector<8x4xf32>, vector<4x128xf32>, vector<8x128xf32> -> vector<8x128xf32>
    %23 = vector.broadcast %1 : vector<1x128xf32> to vector<8x128xf32>
    %24 = arith.addf %22, %23 : vector<8x128xf32>
    %c24 = arith.constant 24 : index
    %c0_19 = arith.constant 0 : index
    %25 = vector.load %arg12[%c24, %c0_19] : memref<64x128xf32, #tpu.memory_space<vmem>>, vector<8x128xf32>
    tpu.vector_store %arg12[%c24, %c0_19], %24 {strides = array<i32>} : memref<64x128xf32, #tpu.memory_space<vmem>>, vector<8x128xf32>,
    %c4 = arith.constant 4 : index
    %c0_20 = arith.constant 0 : index
    %c0_21 = arith.constant 0 : index
    %26 = vector.load %arg0[%c4, %c0_20, %c0_21] : memref<8x8x4xf32, #tpu.memory_space<vmem>>, vector<1x8x4xf32>
    %27 = vector.shape_cast %26 : vector<1x8x4xf32> to vector<8x4xf32>
    %cst_22 = arith.constant dense<0.000000e+00> : vector<8x128xf32>
    %28 = tpu.matmul %27, %0, %cst_22 {dimension_numbers = #tpu.dot_dimension_numbers<[1], [0], [0], [1], [0, 0, 1, 1], [], []>} : vector<8x4xf32>, vector<4x128xf32>, vector<8x128xf32> -> vector<8x128xf32>
    %29 = vector.broadcast %1 : vector<1x128xf32> to vector<8x128xf32>
    %30 = arith.addf %28, %29 : vector<8x128xf32>
    %c32 = arith.constant 32 : index
    %c0_23 = arith.constant 0 : index
    %31 = vector.load %arg12[%c32, %c0_23] : memref<64x128xf32, #tpu.memory_space<vmem>>, vector<8x128xf32>
    tpu.vector_store %arg12[%c32, %c0_23], %30 {strides = array<i32>} : memref<64x128xf32, #tpu.memory_space<vmem>>, vector<8x128xf32>,
    %c5 = arith.constant 5 : index
    %c0_24 = arith.constant 0 : index
    %c0_25 = arith.constant 0 : index
    %32 = vector.load %arg0[%c5, %c0_24, %c0_25] : memref<8x8x4xf32, #tpu.memory_space<vmem>>, vector<1x8x4xf32>
    %33 = vector.shape_cast %32 : vector<1x8x4xf32> to vector<8x4xf32>
    %cst_26 = arith.constant dense<0.000000e+00> : vector<8x128xf32>
    %34 = tpu.matmul %33, %0, %cst_26 {dimension_numbers = #tpu.dot_dimension_numbers<[1], [0], [0], [1], [0, 0, 1, 1], [], []>} : vector<8x4xf32>, vector<4x128xf32>, vector<8x128xf32> -> vector<8x128xf32>
    %35 = vector.broadcast %1 : vector<1x128xf32> to vector<8x128xf32>
    %36 = arith.addf %34, %35 : vector<8x128xf32>
    %c40 = arith.constant 40 : index
    %c0_27 = arith.constant 0 : index
    %37 = vector.load %arg12[%c40, %c0_27] : memref<64x128xf32, #tpu.memory_space<vmem>>, vector<8x128xf32>
    tpu.vector_store %arg12[%c40, %c0_27], %36 {strides = array<i32>} : memref<64x128xf32, #tpu.memory_space<vmem>>, vector<8x128xf32>,
    %c6 = arith.constant 6 : index
    %c0_28 = arith.constant 0 : index
    %c0_29 = arith.constant 0 : index
    %38 = vector.load %arg0[%c6, %c0_28, %c0_29] : memref<8x8x4xf32, #tpu.memory_space<vmem>>, vector<1x8x4xf32>
    %39 = vector.shape_cast %38 : vector<1x8x4xf32> to vector<8x4xf32>
    %cst_30 = arith.constant dense<0.000000e+00> : vector<8x128xf32>
    %40 = tpu.matmul %39, %0, %cst_30 {dimension_numbers = #tpu.dot_dimension_numbers<[1], [0], [0], [1], [0, 0, 1, 1], [], []>} : vector<8x4xf32>, vector<4x128xf32>, vector<8x128xf32> -> vector<8x128xf32>
    %41 = vector.broadcast %1 : vector<1x128xf32> to vector<8x128xf32>
    %42 = arith.addf %40, %41 : vector<8x128xf32>
    %c48 = arith.constant 48 : index
    %c0_31 = arith.constant 0 : index
    %43 = vector.load %arg12[%c48, %c0_31] : memref<64x128xf32, #tpu.memory_space<vmem>>, vector<8x128xf32>
    tpu.vector_store %arg12[%c48, %c0_31], %42 {strides = array<i32>} : memref<64x128xf32, #tpu.memory_space<vmem>>, vector<8x128xf32>,
    %c7 = arith.constant 7 : index
    %c0_32 = arith.constant 0 : index
    %c0_33 = arith.constant 0 : index
    %44 = vector.load %arg0[%c7, %c0_32, %c0_33] : memref<8x8x4xf32, #tpu.memory_space<vmem>>, vector<1x8x4xf32>
    %45 = vector.shape_cast %44 : vector<1x8x4xf32> to vector<8x4xf32>
    %cst_34 = arith.constant dense<0.000000e+00> : vector<8x128xf32>
    %46 = tpu.matmul %45, %0, %cst_34 {dimension_numbers = #tpu.dot_dimension_numbers<[1], [0], [0], [1], [0, 0, 1, 1], [], []>} : vector<8x4xf32>, vector<4x128xf32>, vector<8x128xf32> -> vector<8x128xf32>
    %47 = vector.broadcast %1 : vector<1x128xf32> to vector<8x128xf32>
    %48 = arith.addf %46, %47 : vector<8x128xf32>
    %c56 = arith.constant 56 : index
    %c0_35 = arith.constant 0 : index
    %49 = vector.load %arg12[%c56, %c0_35] : memref<64x128xf32, #tpu.memory_space<vmem>>, vector<8x128xf32>
    tpu.vector_store %arg12[%c56, %c0_35], %48 {strides = array<i32>} : memref<64x128xf32, #tpu.memory_space<vmem>>, vector<8x128xf32>,
    %c0_36 = arith.constant 0 : index
    %c0_37 = arith.constant 0 : index
    %50 = vector.load %arg2[%c0_36, %c0_37] : memref<32x128xbf16, #tpu.memory_space<vmem>>, vector<32x128xbf16>
    %c0_38 = arith.constant 0 : index
    %c0_39 = arith.constant 0 : index
    %c0_40 = arith.constant 0 : index
    %51 = vector.load %arg9[%c0_38, %c0_39, %c0_40] : memref<2x8x32xf32, #tpu.memory_space<vmem>>, vector<1x8x32xf32>
    %52 = vector.shape_cast %51 : vector<1x8x32xf32> to vector<8x32xf32>
    %c0_41 = arith.constant 0 : index
    %c0_42 = arith.constant 0 : index
    %c0_43 = arith.constant 0 : index
    %53 = vector.load %arg10[%c0_41, %c0_42, %c0_43] : memref<2x8x32xf32, #tpu.memory_space<vmem>>, vector<1x8x32xf32>
    %54 = vector.shape_cast %53 : vector<1x8x32xf32> to vector<8x32xf32>
    %c0_44 = arith.constant 0 : index
    %c0_45 = arith.constant 0 : index
    %55 = vector.load %arg12[%c0_44, %c0_45] : memref<64x128xf32, #tpu.memory_space<vmem>>, vector<8x128xf32>
    %56 = arith.truncf %52 : vector<8x32xf32> to vector<8x32xbf16>
    %cst_46 = arith.constant dense<0.000000e+00> : vector<8x128xf32>
    %57 = tpu.matmul %56, %50, %cst_46 {dimension_numbers = #tpu.dot_dimension_numbers<[1], [0], [0], [1], [0, 0, 1, 1], [], []>} : vector<8x32xbf16>, vector<32x128xbf16>, vector<8x128xf32> -> vector<8x128xf32>
    %58 = arith.addf %55, %57 : vector<8x128xf32>
    %59 = arith.negf %58 : vector<8x128xf32>
    %60 = math.exp %59 : vector<8x128xf32>
    %cst_47 = arith.constant 1.000000e+00 : f32
    %61 = vector.broadcast %cst_47 : f32 to vector<8x128xf32>
    %62 = arith.addf %61, %60 : vector<8x128xf32>
    %63 = arith.divf %61, %62 : vector<8x128xf32>
    %64 = math.tanh %58 : vector<8x128xf32>
    %65 = vector.extract_strided_slice %63 {offsets = [0, 0], sizes = [8, 32], strides = [1, 1]} : vector<8x128xf32> to vector<8x32xf32>
    %66 = vector.extract_strided_slice %63 {offsets = [0, 32], sizes = [8, 32], strides = [1, 1]} : vector<8x128xf32> to vector<8x32xf32>
    %67 = vector.extract_strided_slice %64 {offsets = [0, 64], sizes = [8, 32], strides = [1, 1]} : vector<8x128xf32> to vector<8x32xf32>
    %68 = vector.extract_strided_slice %63 {offsets = [0, 96], sizes = [8, 32], strides = [1, 1]} : vector<8x128xf32> to vector<8x32xf32>
    %69 = arith.mulf %66, %54 : vector<8x32xf32>
    %70 = arith.mulf %65, %67 : vector<8x32xf32>
    %71 = arith.addf %69, %70 : vector<8x32xf32>
    %72 = math.tanh %71 : vector<8x32xf32>
    %73 = arith.mulf %68, %72 : vector<8x32xf32>
    %c0_48 = arith.constant 0 : index
    %c0_49 = arith.constant 0 : index
    %74 = vector.load %arg13[%c0_48, %c0_49] : memref<64x32xf32, #tpu.memory_space<vmem>>, vector<8x32xf32>
    tpu.vector_store %arg13[%c0_48, %c0_49], %73 {strides = array<i32>} : memref<64x32xf32, #tpu.memory_space<vmem>>, vector<8x32xf32>,
    %c8_50 = arith.constant 8 : index
    %c0_51 = arith.constant 0 : index
    %75 = vector.load %arg12[%c8_50, %c0_51] : memref<64x128xf32, #tpu.memory_space<vmem>>, vector<8x128xf32>
    %76 = arith.truncf %73 : vector<8x32xf32> to vector<8x32xbf16>
    %cst_52 = arith.constant dense<0.000000e+00> : vector<8x128xf32>
    %77 = tpu.matmul %76, %50, %cst_52 {dimension_numbers = #tpu.dot_dimension_numbers<[1], [0], [0], [1], [0, 0, 1, 1], [], []>} : vector<8x32xbf16>, vector<32x128xbf16>, vector<8x128xf32> -> vector<8x128xf32>
    %78 = arith.addf %75, %77 : vector<8x128xf32>
    %79 = arith.negf %78 : vector<8x128xf32>
    %80 = math.exp %79 : vector<8x128xf32>
    %cst_53 = arith.constant 1.000000e+00 : f32
    %81 = vector.broadcast %cst_53 : f32 to vector<8x128xf32>
    %82 = arith.addf %81, %80 : vector<8x128xf32>
    %83 = arith.divf %81, %82 : vector<8x128xf32>
    %84 = math.tanh %78 : vector<8x128xf32>
    %85 = vector.extract_strided_slice %83 {offsets = [0, 0], sizes = [8, 32], strides = [1, 1]} : vector<8x128xf32> to vector<8x32xf32>
    %86 = vector.extract_strided_slice %83 {offsets = [0, 32], sizes = [8, 32], strides = [1, 1]} : vector<8x128xf32> to vector<8x32xf32>
    %87 = vector.extract_strided_slice %84 {offsets = [0, 64], sizes = [8, 32], strides = [1, 1]} : vector<8x128xf32> to vector<8x32xf32>
    %88 = vector.extract_strided_slice %83 {offsets = [0, 96], sizes = [8, 32], strides = [1, 1]} : vector<8x128xf32> to vector<8x32xf32>
    %89 = arith.mulf %86, %71 : vector<8x32xf32>
    %90 = arith.mulf %85, %87 : vector<8x32xf32>
    %91 = arith.addf %89, %90 : vector<8x32xf32>
    %92 = math.tanh %91 : vector<8x32xf32>
    %93 = arith.mulf %88, %92 : vector<8x32xf32>
    %c8_54 = arith.constant 8 : index
    %c0_55 = arith.constant 0 : index
    %94 = vector.load %arg13[%c8_54, %c0_55] : memref<64x32xf32, #tpu.memory_space<vmem>>, vector<8x32xf32>
    tpu.vector_store %arg13[%c8_54, %c0_55], %93 {strides = array<i32>} : memref<64x32xf32, #tpu.memory_space<vmem>>, vector<8x32xf32>,
    %c16_56 = arith.constant 16 : index
    %c0_57 = arith.constant 0 : index
    %95 = vector.load %arg12[%c16_56, %c0_57] : memref<64x128xf32, #tpu.memory_space<vmem>>, vector<8x128xf32>
    %96 = arith.truncf %93 : vector<8x32xf32> to vector<8x32xbf16>
    %cst_58 = arith.constant dense<0.000000e+00> : vector<8x128xf32>
    %97 = tpu.matmul %96, %50, %cst_58 {dimension_numbers = #tpu.dot_dimension_numbers<[1], [0], [0], [1], [0, 0, 1, 1], [], []>} : vector<8x32xbf16>, vector<32x128xbf16>, vector<8x128xf32> -> vector<8x128xf32>
    %98 = arith.addf %95, %97 : vector<8x128xf32>
    %99 = arith.negf %98 : vector<8x128xf32>
    %100 = math.exp %99 : vector<8x128xf32>
    %cst_59 = arith.constant 1.000000e+00 : f32
    %101 = vector.broadcast %cst_59 : f32 to vector<8x128xf32>
    %102 = arith.addf %101, %100 : vector<8x128xf32>
    %103 = arith.divf %101, %102 : vector<8x128xf32>
    %104 = math.tanh %98 : vector<8x128xf32>
    %105 = vector.extract_strided_slice %103 {offsets = [0, 0], sizes = [8, 32], strides = [1, 1]} : vector<8x128xf32> to vector<8x32xf32>
    %106 = vector.extract_strided_slice %103 {offsets = [0, 32], sizes = [8, 32], strides = [1, 1]} : vector<8x128xf32> to vector<8x32xf32>
    %107 = vector.extract_strided_slice %104 {offsets = [0, 64], sizes = [8, 32], strides = [1, 1]} : vector<8x128xf32> to vector<8x32xf32>
    %108 = vector.extract_strided_slice %103 {offsets = [0, 96], sizes = [8, 32], strides = [1, 1]} : vector<8x128xf32> to vector<8x32xf32>
    %109 = arith.mulf %106, %91 : vector<8x32xf32>
    %110 = arith.mulf %105, %107 : vector<8x32xf32>
    %111 = arith.addf %109, %110 : vector<8x32xf32>
    %112 = math.tanh %111 : vector<8x32xf32>
    %113 = arith.mulf %108, %112 : vector<8x32xf32>
    %c16_60 = arith.constant 16 : index
    %c0_61 = arith.constant 0 : index
    %114 = vector.load %arg13[%c16_60, %c0_61] : memref<64x32xf32, #tpu.memory_space<vmem>>, vector<8x32xf32>
    tpu.vector_store %arg13[%c16_60, %c0_61], %113 {strides = array<i32>} : memref<64x32xf32, #tpu.memory_space<vmem>>, vector<8x32xf32>,
    %c24_62 = arith.constant 24 : index
    %c0_63 = arith.constant 0 : index
    %115 = vector.load %arg12[%c24_62, %c0_63] : memref<64x128xf32, #tpu.memory_space<vmem>>, vector<8x128xf32>
    %116 = arith.truncf %113 : vector<8x32xf32> to vector<8x32xbf16>
    %cst_64 = arith.constant dense<0.000000e+00> : vector<8x128xf32>
    %117 = tpu.matmul %116, %50, %cst_64 {dimension_numbers = #tpu.dot_dimension_numbers<[1], [0], [0], [1], [0, 0, 1, 1], [], []>} : vector<8x32xbf16>, vector<32x128xbf16>, vector<8x128xf32> -> vector<8x128xf32>
    %118 = arith.addf %115, %117 : vector<8x128xf32>
    %119 = arith.negf %118 : vector<8x128xf32>
    %120 = math.exp %119 : vector<8x128xf32>
    %cst_65 = arith.constant 1.000000e+00 : f32
    %121 = vector.broadcast %cst_65 : f32 to vector<8x128xf32>
    %122 = arith.addf %121, %120 : vector<8x128xf32>
    %123 = arith.divf %121, %122 : vector<8x128xf32>
    %124 = math.tanh %118 : vector<8x128xf32>
    %125 = vector.extract_strided_slice %123 {offsets = [0, 0], sizes = [8, 32], strides = [1, 1]} : vector<8x128xf32> to vector<8x32xf32>
    %126 = vector.extract_strided_slice %123 {offsets = [0, 32], sizes = [8, 32], strides = [1, 1]} : vector<8x128xf32> to vector<8x32xf32>
    %127 = vector.extract_strided_slice %124 {offsets = [0, 64], sizes = [8, 32], strides = [1, 1]} : vector<8x128xf32> to vector<8x32xf32>
    %128 = vector.extract_strided_slice %123 {offsets = [0, 96], sizes = [8, 32], strides = [1, 1]} : vector<8x128xf32> to vector<8x32xf32>
    %129 = arith.mulf %126, %111 : vector<8x32xf32>
    %130 = arith.mulf %125, %127 : vector<8x32xf32>
    %131 = arith.addf %129, %130 : vector<8x32xf32>
    %132 = math.tanh %131 : vector<8x32xf32>
    %133 = arith.mulf %128, %132 : vector<8x32xf32>
    %c24_66 = arith.constant 24 : index
    %c0_67 = arith.constant 0 : index
    %134 = vector.load %arg13[%c24_66, %c0_67] : memref<64x32xf32, #tpu.memory_space<vmem>>, vector<8x32xf32>
    tpu.vector_store %arg13[%c24_66, %c0_67], %133 {strides = array<i32>} : memref<64x32xf32, #tpu.memory_space<vmem>>, vector<8x32xf32>,
    %c32_68 = arith.constant 32 : index
    %c0_69 = arith.constant 0 : index
    %135 = vector.load %arg12[%c32_68, %c0_69] : memref<64x128xf32, #tpu.memory_space<vmem>>, vector<8x128xf32>
    %136 = arith.truncf %133 : vector<8x32xf32> to vector<8x32xbf16>
    %cst_70 = arith.constant dense<0.000000e+00> : vector<8x128xf32>
    %137 = tpu.matmul %136, %50, %cst_70 {dimension_numbers = #tpu.dot_dimension_numbers<[1], [0], [0], [1], [0, 0, 1, 1], [], []>} : vector<8x32xbf16>, vector<32x128xbf16>, vector<8x128xf32> -> vector<8x128xf32>
    %138 = arith.addf %135, %137 : vector<8x128xf32>
    %139 = arith.negf %138 : vector<8x128xf32>
    %140 = math.exp %139 : vector<8x128xf32>
    %cst_71 = arith.constant 1.000000e+00 : f32
    %141 = vector.broadcast %cst_71 : f32 to vector<8x128xf32>
    %142 = arith.addf %141, %140 : vector<8x128xf32>
    %143 = arith.divf %141, %142 : vector<8x128xf32>
    %144 = math.tanh %138 : vector<8x128xf32>
    %145 = vector.extract_strided_slice %143 {offsets = [0, 0], sizes = [8, 32], strides = [1, 1]} : vector<8x128xf32> to vector<8x32xf32>
    %146 = vector.extract_strided_slice %143 {offsets = [0, 32], sizes = [8, 32], strides = [1, 1]} : vector<8x128xf32> to vector<8x32xf32>
    %147 = vector.extract_strided_slice %144 {offsets = [0, 64], sizes = [8, 32], strides = [1, 1]} : vector<8x128xf32> to vector<8x32xf32>
    %148 = vector.extract_strided_slice %143 {offsets = [0, 96], sizes = [8, 32], strides = [1, 1]} : vector<8x128xf32> to vector<8x32xf32>
    %149 = arith.mulf %146, %131 : vector<8x32xf32>
    %150 = arith.mulf %145, %147 : vector<8x32xf32>
    %151 = arith.addf %149, %150 : vector<8x32xf32>
    %152 = math.tanh %151 : vector<8x32xf32>
    %153 = arith.mulf %148, %152 : vector<8x32xf32>
    %c32_72 = arith.constant 32 : index
    %c0_73 = arith.constant 0 : index
    %154 = vector.load %arg13[%c32_72, %c0_73] : memref<64x32xf32, #tpu.memory_space<vmem>>, vector<8x32xf32>
    tpu.vector_store %arg13[%c32_72, %c0_73], %153 {strides = array<i32>} : memref<64x32xf32, #tpu.memory_space<vmem>>, vector<8x32xf32>,
    %c40_74 = arith.constant 40 : index
    %c0_75 = arith.constant 0 : index
    %155 = vector.load %arg12[%c40_74, %c0_75] : memref<64x128xf32, #tpu.memory_space<vmem>>, vector<8x128xf32>
    %156 = arith.truncf %153 : vector<8x32xf32> to vector<8x32xbf16>
    %cst_76 = arith.constant dense<0.000000e+00> : vector<8x128xf32>
    %157 = tpu.matmul %156, %50, %cst_76 {dimension_numbers = #tpu.dot_dimension_numbers<[1], [0], [0], [1], [0, 0, 1, 1], [], []>} : vector<8x32xbf16>, vector<32x128xbf16>, vector<8x128xf32> -> vector<8x128xf32>
    %158 = arith.addf %155, %157 : vector<8x128xf32>
    %159 = arith.negf %158 : vector<8x128xf32>
    %160 = math.exp %159 : vector<8x128xf32>
    %cst_77 = arith.constant 1.000000e+00 : f32
    %161 = vector.broadcast %cst_77 : f32 to vector<8x128xf32>
    %162 = arith.addf %161, %160 : vector<8x128xf32>
    %163 = arith.divf %161, %162 : vector<8x128xf32>
    %164 = math.tanh %158 : vector<8x128xf32>
    %165 = vector.extract_strided_slice %163 {offsets = [0, 0], sizes = [8, 32], strides = [1, 1]} : vector<8x128xf32> to vector<8x32xf32>
    %166 = vector.extract_strided_slice %163 {offsets = [0, 32], sizes = [8, 32], strides = [1, 1]} : vector<8x128xf32> to vector<8x32xf32>
    %167 = vector.extract_strided_slice %164 {offsets = [0, 64], sizes = [8, 32], strides = [1, 1]} : vector<8x128xf32> to vector<8x32xf32>
    %168 = vector.extract_strided_slice %163 {offsets = [0, 96], sizes = [8, 32], strides = [1, 1]} : vector<8x128xf32> to vector<8x32xf32>
    %169 = arith.mulf %166, %151 : vector<8x32xf32>
    %170 = arith.mulf %165, %167 : vector<8x32xf32>
    %171 = arith.addf %169, %170 : vector<8x32xf32>
    %172 = math.tanh %171 : vector<8x32xf32>
    %173 = arith.mulf %168, %172 : vector<8x32xf32>
    %c40_78 = arith.constant 40 : index
    %c0_79 = arith.constant 0 : index
    %174 = vector.load %arg13[%c40_78, %c0_79] : memref<64x32xf32, #tpu.memory_space<vmem>>, vector<8x32xf32>
    tpu.vector_store %arg13[%c40_78, %c0_79], %173 {strides = array<i32>} : memref<64x32xf32, #tpu.memory_space<vmem>>, vector<8x32xf32>,
    %c48_80 = arith.constant 48 : index
    %c0_81 = arith.constant 0 : index
    %175 = vector.load %arg12[%c48_80, %c0_81] : memref<64x128xf32, #tpu.memory_space<vmem>>, vector<8x128xf32>
    %176 = arith.truncf %173 : vector<8x32xf32> to vector<8x32xbf16>
    %cst_82 = arith.constant dense<0.000000e+00> : vector<8x128xf32>
    %177 = tpu.matmul %176, %50, %cst_82 {dimension_numbers = #tpu.dot_dimension_numbers<[1], [0], [0], [1], [0, 0, 1, 1], [], []>} : vector<8x32xbf16>, vector<32x128xbf16>, vector<8x128xf32> -> vector<8x128xf32>
    %178 = arith.addf %175, %177 : vector<8x128xf32>
    %179 = arith.negf %178 : vector<8x128xf32>
    %180 = math.exp %179 : vector<8x128xf32>
    %cst_83 = arith.constant 1.000000e+00 : f32
    %181 = vector.broadcast %cst_83 : f32 to vector<8x128xf32>
    %182 = arith.addf %181, %180 : vector<8x128xf32>
    %183 = arith.divf %181, %182 : vector<8x128xf32>
    %184 = math.tanh %178 : vector<8x128xf32>
    %185 = vector.extract_strided_slice %183 {offsets = [0, 0], sizes = [8, 32], strides = [1, 1]} : vector<8x128xf32> to vector<8x32xf32>
    %186 = vector.extract_strided_slice %183 {offsets = [0, 32], sizes = [8, 32], strides = [1, 1]} : vector<8x128xf32> to vector<8x32xf32>
    %187 = vector.extract_strided_slice %184 {offsets = [0, 64], sizes = [8, 32], strides = [1, 1]} : vector<8x128xf32> to vector<8x32xf32>
    %188 = vector.extract_strided_slice %183 {offsets = [0, 96], sizes = [8, 32], strides = [1, 1]} : vector<8x128xf32> to vector<8x32xf32>
    %189 = arith.mulf %186, %171 : vector<8x32xf32>
    %190 = arith.mulf %185, %187 : vector<8x32xf32>
    %191 = arith.addf %189, %190 : vector<8x32xf32>
    %192 = math.tanh %191 : vector<8x32xf32>
    %193 = arith.mulf %188, %192 : vector<8x32xf32>
    %c48_84 = arith.constant 48 : index
    %c0_85 = arith.constant 0 : index
    %194 = vector.load %arg13[%c48_84, %c0_85] : memref<64x32xf32, #tpu.memory_space<vmem>>, vector<8x32xf32>
    tpu.vector_store %arg13[%c48_84, %c0_85], %193 {strides = array<i32>} : memref<64x32xf32, #tpu.memory_space<vmem>>, vector<8x32xf32>,
    %c56_86 = arith.constant 56 : index
    %c0_87 = arith.constant 0 : index
    %195 = vector.load %arg12[%c56_86, %c0_87] : memref<64x128xf32, #tpu.memory_space<vmem>>, vector<8x128xf32>
    %196 = arith.truncf %193 : vector<8x32xf32> to vector<8x32xbf16>
    %cst_88 = arith.constant dense<0.000000e+00> : vector<8x128xf32>
    %197 = tpu.matmul %196, %50, %cst_88 {dimension_numbers = #tpu.dot_dimension_numbers<[1], [0], [0], [1], [0, 0, 1, 1], [], []>} : vector<8x32xbf16>, vector<32x128xbf16>, vector<8x128xf32> -> vector<8x128xf32>
    %198 = arith.addf %195, %197 : vector<8x128xf32>
    %199 = arith.negf %198 : vector<8x128xf32>
    %200 = math.exp %199 : vector<8x128xf32>
    %cst_89 = arith.constant 1.000000e+00 : f32
    %201 = vector.broadcast %cst_89 : f32 to vector<8x128xf32>
    %202 = arith.addf %201, %200 : vector<8x128xf32>
    %203 = arith.divf %201, %202 : vector<8x128xf32>
    %204 = math.tanh %198 : vector<8x128xf32>
    %205 = vector.extract_strided_slice %203 {offsets = [0, 0], sizes = [8, 32], strides = [1, 1]} : vector<8x128xf32> to vector<8x32xf32>
    %206 = vector.extract_strided_slice %203 {offsets = [0, 32], sizes = [8, 32], strides = [1, 1]} : vector<8x128xf32> to vector<8x32xf32>
    %207 = vector.extract_strided_slice %204 {offsets = [0, 64], sizes = [8, 32], strides = [1, 1]} : vector<8x128xf32> to vector<8x32xf32>
    %208 = vector.extract_strided_slice %203 {offsets = [0, 96], sizes = [8, 32], strides = [1, 1]} : vector<8x128xf32> to vector<8x32xf32>
    %209 = arith.mulf %206, %191 : vector<8x32xf32>
    %210 = arith.mulf %205, %207 : vector<8x32xf32>
    %211 = arith.addf %209, %210 : vector<8x32xf32>
    %212 = math.tanh %211 : vector<8x32xf32>
    %213 = arith.mulf %208, %212 : vector<8x32xf32>
    %c56_90 = arith.constant 56 : index
    %c0_91 = arith.constant 0 : index
    %214 = vector.load %arg13[%c56_90, %c0_91] : memref<64x32xf32, #tpu.memory_space<vmem>>, vector<8x32xf32>
    tpu.vector_store %arg13[%c56_90, %c0_91], %213 {strides = array<i32>} : memref<64x32xf32, #tpu.memory_space<vmem>>, vector<8x32xf32>,
    %c0_92 = arith.constant 0 : index
    %c0_93 = arith.constant 0 : index
    %215 = vector.load %arg4[%c0_92, %c0_93] : memref<32x128xf32, #tpu.memory_space<vmem>>, vector<32x128xf32>
    %c0_94 = arith.constant 0 : index
    %c0_95 = arith.constant 0 : index
    %216 = vector.load %arg6[%c0_94, %c0_95] : memref<1x128xf32, #tpu.memory_space<vmem>>, vector<1x128xf32>
    %c0_96 = arith.constant 0 : index
    %c0_97 = arith.constant 0 : index
    %217 = vector.load %arg13[%c0_96, %c0_97] : memref<64x32xf32, #tpu.memory_space<vmem>>, vector<64x32xf32>
    %cst_98 = arith.constant dense<0.000000e+00> : vector<64x128xf32>
    %218 = tpu.matmul %217, %215, %cst_98 {dimension_numbers = #tpu.dot_dimension_numbers<[1], [0], [0], [1], [0, 0, 1, 1], [], []>} : vector<64x32xf32>, vector<32x128xf32>, vector<64x128xf32> -> vector<64x128xf32>
    %219 = vector.broadcast %216 : vector<1x128xf32> to vector<64x128xf32>
    %220 = arith.addf %218, %219 : vector<64x128xf32>
    %c0_99 = arith.constant 0 : index
    %c0_100 = arith.constant 0 : index
    %221 = vector.load %arg12[%c0_99, %c0_100] : memref<64x128xf32, #tpu.memory_space<vmem>>, vector<64x128xf32>
    tpu.vector_store %arg12[%c0_99, %c0_100], %220 {strides = array<i32>} : memref<64x128xf32, #tpu.memory_space<vmem>>, vector<64x128xf32>,
    %c0_101 = arith.constant 0 : index
    %c0_102 = arith.constant 0 : index
    %222 = vector.load %arg5[%c0_101, %c0_102] : memref<32x128xbf16, #tpu.memory_space<vmem>>, vector<32x128xbf16>
    %c1_103 = arith.constant 1 : index
    %c0_104 = arith.constant 0 : index
    %c0_105 = arith.constant 0 : index
    %223 = vector.load %arg9[%c1_103, %c0_104, %c0_105] : memref<2x8x32xf32, #tpu.memory_space<vmem>>, vector<1x8x32xf32>
    %224 = vector.shape_cast %223 : vector<1x8x32xf32> to vector<8x32xf32>
    %c1_106 = arith.constant 1 : index
    %c0_107 = arith.constant 0 : index
    %c0_108 = arith.constant 0 : index
    %225 = vector.load %arg10[%c1_106, %c0_107, %c0_108] : memref<2x8x32xf32, #tpu.memory_space<vmem>>, vector<1x8x32xf32>
    %226 = vector.shape_cast %225 : vector<1x8x32xf32> to vector<8x32xf32>
    %c0_109 = arith.constant 0 : index
    %c0_110 = arith.constant 0 : index
    %227 = vector.load %arg12[%c0_109, %c0_110] : memref<64x128xf32, #tpu.memory_space<vmem>>, vector<8x128xf32>
    %228 = arith.truncf %224 : vector<8x32xf32> to vector<8x32xbf16>
    %cst_111 = arith.constant dense<0.000000e+00> : vector<8x128xf32>
    %229 = tpu.matmul %228, %222, %cst_111 {dimension_numbers = #tpu.dot_dimension_numbers<[1], [0], [0], [1], [0, 0, 1, 1], [], []>} : vector<8x32xbf16>, vector<32x128xbf16>, vector<8x128xf32> -> vector<8x128xf32>
    %230 = arith.addf %227, %229 : vector<8x128xf32>
    %231 = arith.negf %230 : vector<8x128xf32>
    %232 = math.exp %231 : vector<8x128xf32>
    %cst_112 = arith.constant 1.000000e+00 : f32
    %233 = vector.broadcast %cst_112 : f32 to vector<8x128xf32>
    %234 = arith.addf %233, %232 : vector<8x128xf32>
    %235 = arith.divf %233, %234 : vector<8x128xf32>
    %236 = math.tanh %230 : vector<8x128xf32>
    %237 = vector.extract_strided_slice %235 {offsets = [0, 0], sizes = [8, 32], strides = [1, 1]} : vector<8x128xf32> to vector<8x32xf32>
    %238 = vector.extract_strided_slice %235 {offsets = [0, 32], sizes = [8, 32], strides = [1, 1]} : vector<8x128xf32> to vector<8x32xf32>
    %239 = vector.extract_strided_slice %236 {offsets = [0, 64], sizes = [8, 32], strides = [1, 1]} : vector<8x128xf32> to vector<8x32xf32>
    %240 = vector.extract_strided_slice %235 {offsets = [0, 96], sizes = [8, 32], strides = [1, 1]} : vector<8x128xf32> to vector<8x32xf32>
    %241 = arith.mulf %238, %226 : vector<8x32xf32>
    %242 = arith.mulf %237, %239 : vector<8x32xf32>
    %243 = arith.addf %241, %242 : vector<8x32xf32>
    %244 = math.tanh %243 : vector<8x32xf32>
    %245 = arith.mulf %240, %244 : vector<8x32xf32>
    %c8_113 = arith.constant 8 : index
    %c0_114 = arith.constant 0 : index
    %246 = vector.load %arg12[%c8_113, %c0_114] : memref<64x128xf32, #tpu.memory_space<vmem>>, vector<8x128xf32>
    %247 = arith.truncf %245 : vector<8x32xf32> to vector<8x32xbf16>
    %cst_115 = arith.constant dense<0.000000e+00> : vector<8x128xf32>
    %248 = tpu.matmul %247, %222, %cst_115 {dimension_numbers = #tpu.dot_dimension_numbers<[1], [0], [0], [1], [0, 0, 1, 1], [], []>} : vector<8x32xbf16>, vector<32x128xbf16>, vector<8x128xf32> -> vector<8x128xf32>
    %249 = arith.addf %246, %248 : vector<8x128xf32>
    %250 = arith.negf %249 : vector<8x128xf32>
    %251 = math.exp %250 : vector<8x128xf32>
    %cst_116 = arith.constant 1.000000e+00 : f32
    %252 = vector.broadcast %cst_116 : f32 to vector<8x128xf32>
    %253 = arith.addf %252, %251 : vector<8x128xf32>
    %254 = arith.divf %252, %253 : vector<8x128xf32>
    %255 = math.tanh %249 : vector<8x128xf32>
    %256 = vector.extract_strided_slice %254 {offsets = [0, 0], sizes = [8, 32], strides = [1, 1]} : vector<8x128xf32> to vector<8x32xf32>
    %257 = vector.extract_strided_slice %254 {offsets = [0, 32], sizes = [8, 32], strides = [1, 1]} : vector<8x128xf32> to vector<8x32xf32>
    %258 = vector.extract_strided_slice %255 {offsets = [0, 64], sizes = [8, 32], strides = [1, 1]} : vector<8x128xf32> to vector<8x32xf32>
    %259 = vector.extract_strided_slice %254 {offsets = [0, 96], sizes = [8, 32], strides = [1, 1]} : vector<8x128xf32> to vector<8x32xf32>
    %260 = arith.mulf %257, %243 : vector<8x32xf32>
    %261 = arith.mulf %256, %258 : vector<8x32xf32>
    %262 = arith.addf %260, %261 : vector<8x32xf32>
    %263 = math.tanh %262 : vector<8x32xf32>
    %264 = arith.mulf %259, %263 : vector<8x32xf32>
    %c16_117 = arith.constant 16 : index
    %c0_118 = arith.constant 0 : index
    %265 = vector.load %arg12[%c16_117, %c0_118] : memref<64x128xf32, #tpu.memory_space<vmem>>, vector<8x128xf32>
    %266 = arith.truncf %264 : vector<8x32xf32> to vector<8x32xbf16>
    %cst_119 = arith.constant dense<0.000000e+00> : vector<8x128xf32>
    %267 = tpu.matmul %266, %222, %cst_119 {dimension_numbers = #tpu.dot_dimension_numbers<[1], [0], [0], [1], [0, 0, 1, 1], [], []>} : vector<8x32xbf16>, vector<32x128xbf16>, vector<8x128xf32> -> vector<8x128xf32>
    %268 = arith.addf %265, %267 : vector<8x128xf32>
    %269 = arith.negf %268 : vector<8x128xf32>
    %270 = math.exp %269 : vector<8x128xf32>
    %cst_120 = arith.constant 1.000000e+00 : f32
    %271 = vector.broadcast %cst_120 : f32 to vector<8x128xf32>
    %272 = arith.addf %271, %270 : vector<8x128xf32>
    %273 = arith.divf %271, %272 : vector<8x128xf32>
    %274 = math.tanh %268 : vector<8x128xf32>
    %275 = vector.extract_strided_slice %273 {offsets = [0, 0], sizes = [8, 32], strides = [1, 1]} : vector<8x128xf32> to vector<8x32xf32>
    %276 = vector.extract_strided_slice %273 {offsets = [0, 32], sizes = [8, 32], strides = [1, 1]} : vector<8x128xf32> to vector<8x32xf32>
    %277 = vector.extract_strided_slice %274 {offsets = [0, 64], sizes = [8, 32], strides = [1, 1]} : vector<8x128xf32> to vector<8x32xf32>
    %278 = vector.extract_strided_slice %273 {offsets = [0, 96], sizes = [8, 32], strides = [1, 1]} : vector<8x128xf32> to vector<8x32xf32>
    %279 = arith.mulf %276, %262 : vector<8x32xf32>
    %280 = arith.mulf %275, %277 : vector<8x32xf32>
    %281 = arith.addf %279, %280 : vector<8x32xf32>
    %282 = math.tanh %281 : vector<8x32xf32>
    %283 = arith.mulf %278, %282 : vector<8x32xf32>
    %c24_121 = arith.constant 24 : index
    %c0_122 = arith.constant 0 : index
    %284 = vector.load %arg12[%c24_121, %c0_122] : memref<64x128xf32, #tpu.memory_space<vmem>>, vector<8x128xf32>
    %285 = arith.truncf %283 : vector<8x32xf32> to vector<8x32xbf16>
    %cst_123 = arith.constant dense<0.000000e+00> : vector<8x128xf32>
    %286 = tpu.matmul %285, %222, %cst_123 {dimension_numbers = #tpu.dot_dimension_numbers<[1], [0], [0], [1], [0, 0, 1, 1], [], []>} : vector<8x32xbf16>, vector<32x128xbf16>, vector<8x128xf32> -> vector<8x128xf32>
    %287 = arith.addf %284, %286 : vector<8x128xf32>
    %288 = arith.negf %287 : vector<8x128xf32>
    %289 = math.exp %288 : vector<8x128xf32>
    %cst_124 = arith.constant 1.000000e+00 : f32
    %290 = vector.broadcast %cst_124 : f32 to vector<8x128xf32>
    %291 = arith.addf %290, %289 : vector<8x128xf32>
    %292 = arith.divf %290, %291 : vector<8x128xf32>
    %293 = math.tanh %287 : vector<8x128xf32>
    %294 = vector.extract_strided_slice %292 {offsets = [0, 0], sizes = [8, 32], strides = [1, 1]} : vector<8x128xf32> to vector<8x32xf32>
    %295 = vector.extract_strided_slice %292 {offsets = [0, 32], sizes = [8, 32], strides = [1, 1]} : vector<8x128xf32> to vector<8x32xf32>
    %296 = vector.extract_strided_slice %293 {offsets = [0, 64], sizes = [8, 32], strides = [1, 1]} : vector<8x128xf32> to vector<8x32xf32>
    %297 = vector.extract_strided_slice %292 {offsets = [0, 96], sizes = [8, 32], strides = [1, 1]} : vector<8x128xf32> to vector<8x32xf32>
    %298 = arith.mulf %295, %281 : vector<8x32xf32>
    %299 = arith.mulf %294, %296 : vector<8x32xf32>
    %300 = arith.addf %298, %299 : vector<8x32xf32>
    %301 = math.tanh %300 : vector<8x32xf32>
    %302 = arith.mulf %297, %301 : vector<8x32xf32>
    %c32_125 = arith.constant 32 : index
    %c0_126 = arith.constant 0 : index
    %303 = vector.load %arg12[%c32_125, %c0_126] : memref<64x128xf32, #tpu.memory_space<vmem>>, vector<8x128xf32>
    %304 = arith.truncf %302 : vector<8x32xf32> to vector<8x32xbf16>
    %cst_127 = arith.constant dense<0.000000e+00> : vector<8x128xf32>
    %305 = tpu.matmul %304, %222, %cst_127 {dimension_numbers = #tpu.dot_dimension_numbers<[1], [0], [0], [1], [0, 0, 1, 1], [], []>} : vector<8x32xbf16>, vector<32x128xbf16>, vector<8x128xf32> -> vector<8x128xf32>
    %306 = arith.addf %303, %305 : vector<8x128xf32>
    %307 = arith.negf %306 : vector<8x128xf32>
    %308 = math.exp %307 : vector<8x128xf32>
    %cst_128 = arith.constant 1.000000e+00 : f32
    %309 = vector.broadcast %cst_128 : f32 to vector<8x128xf32>
    %310 = arith.addf %309, %308 : vector<8x128xf32>
    %311 = arith.divf %309, %310 : vector<8x128xf32>
    %312 = math.tanh %306 : vector<8x128xf32>
    %313 = vector.extract_strided_slice %311 {offsets = [0, 0], sizes = [8, 32], strides = [1, 1]} : vector<8x128xf32> to vector<8x32xf32>
    %314 = vector.extract_strided_slice %311 {offsets = [0, 32], sizes = [8, 32], strides = [1, 1]} : vector<8x128xf32> to vector<8x32xf32>
    %315 = vector.extract_strided_slice %312 {offsets = [0, 64], sizes = [8, 32], strides = [1, 1]} : vector<8x128xf32> to vector<8x32xf32>
    %316 = vector.extract_strided_slice %311 {offsets = [0, 96], sizes = [8, 32], strides = [1, 1]} : vector<8x128xf32> to vector<8x32xf32>
    %317 = arith.mulf %314, %300 : vector<8x32xf32>
    %318 = arith.mulf %313, %315 : vector<8x32xf32>
    %319 = arith.addf %317, %318 : vector<8x32xf32>
    %320 = math.tanh %319 : vector<8x32xf32>
    %321 = arith.mulf %316, %320 : vector<8x32xf32>
    %c40_129 = arith.constant 40 : index
    %c0_130 = arith.constant 0 : index
    %322 = vector.load %arg12[%c40_129, %c0_130] : memref<64x128xf32, #tpu.memory_space<vmem>>, vector<8x128xf32>
    %323 = arith.truncf %321 : vector<8x32xf32> to vector<8x32xbf16>
    %cst_131 = arith.constant dense<0.000000e+00> : vector<8x128xf32>
    %324 = tpu.matmul %323, %222, %cst_131 {dimension_numbers = #tpu.dot_dimension_numbers<[1], [0], [0], [1], [0, 0, 1, 1], [], []>} : vector<8x32xbf16>, vector<32x128xbf16>, vector<8x128xf32> -> vector<8x128xf32>
    %325 = arith.addf %322, %324 : vector<8x128xf32>
    %326 = arith.negf %325 : vector<8x128xf32>
    %327 = math.exp %326 : vector<8x128xf32>
    %cst_132 = arith.constant 1.000000e+00 : f32
    %328 = vector.broadcast %cst_132 : f32 to vector<8x128xf32>
    %329 = arith.addf %328, %327 : vector<8x128xf32>
    %330 = arith.divf %328, %329 : vector<8x128xf32>
    %331 = math.tanh %325 : vector<8x128xf32>
    %332 = vector.extract_strided_slice %330 {offsets = [0, 0], sizes = [8, 32], strides = [1, 1]} : vector<8x128xf32> to vector<8x32xf32>
    %333 = vector.extract_strided_slice %330 {offsets = [0, 32], sizes = [8, 32], strides = [1, 1]} : vector<8x128xf32> to vector<8x32xf32>
    %334 = vector.extract_strided_slice %331 {offsets = [0, 64], sizes = [8, 32], strides = [1, 1]} : vector<8x128xf32> to vector<8x32xf32>
    %335 = vector.extract_strided_slice %330 {offsets = [0, 96], sizes = [8, 32], strides = [1, 1]} : vector<8x128xf32> to vector<8x32xf32>
    %336 = arith.mulf %333, %319 : vector<8x32xf32>
    %337 = arith.mulf %332, %334 : vector<8x32xf32>
    %338 = arith.addf %336, %337 : vector<8x32xf32>
    %339 = math.tanh %338 : vector<8x32xf32>
    %340 = arith.mulf %335, %339 : vector<8x32xf32>
    %c48_133 = arith.constant 48 : index
    %c0_134 = arith.constant 0 : index
    %341 = vector.load %arg12[%c48_133, %c0_134] : memref<64x128xf32, #tpu.memory_space<vmem>>, vector<8x128xf32>
    %342 = arith.truncf %340 : vector<8x32xf32> to vector<8x32xbf16>
    %cst_135 = arith.constant dense<0.000000e+00> : vector<8x128xf32>
    %343 = tpu.matmul %342, %222, %cst_135 {dimension_numbers = #tpu.dot_dimension_numbers<[1], [0], [0], [1], [0, 0, 1, 1], [], []>} : vector<8x32xbf16>, vector<32x128xbf16>, vector<8x128xf32> -> vector<8x128xf32>
    %344 = arith.addf %341, %343 : vector<8x128xf32>
    %345 = arith.negf %344 : vector<8x128xf32>
    %346 = math.exp %345 : vector<8x128xf32>
    %cst_136 = arith.constant 1.000000e+00 : f32
    %347 = vector.broadcast %cst_136 : f32 to vector<8x128xf32>
    %348 = arith.addf %347, %346 : vector<8x128xf32>
    %349 = arith.divf %347, %348 : vector<8x128xf32>
    %350 = math.tanh %344 : vector<8x128xf32>
    %351 = vector.extract_strided_slice %349 {offsets = [0, 0], sizes = [8, 32], strides = [1, 1]} : vector<8x128xf32> to vector<8x32xf32>
    %352 = vector.extract_strided_slice %349 {offsets = [0, 32], sizes = [8, 32], strides = [1, 1]} : vector<8x128xf32> to vector<8x32xf32>
    %353 = vector.extract_strided_slice %350 {offsets = [0, 64], sizes = [8, 32], strides = [1, 1]} : vector<8x128xf32> to vector<8x32xf32>
    %354 = vector.extract_strided_slice %349 {offsets = [0, 96], sizes = [8, 32], strides = [1, 1]} : vector<8x128xf32> to vector<8x32xf32>
    %355 = arith.mulf %352, %338 : vector<8x32xf32>
    %356 = arith.mulf %351, %353 : vector<8x32xf32>
    %357 = arith.addf %355, %356 : vector<8x32xf32>
    %358 = math.tanh %357 : vector<8x32xf32>
    %359 = arith.mulf %354, %358 : vector<8x32xf32>
    %c56_137 = arith.constant 56 : index
    %c0_138 = arith.constant 0 : index
    %360 = vector.load %arg12[%c56_137, %c0_138] : memref<64x128xf32, #tpu.memory_space<vmem>>, vector<8x128xf32>
    %361 = arith.truncf %359 : vector<8x32xf32> to vector<8x32xbf16>
    %cst_139 = arith.constant dense<0.000000e+00> : vector<8x128xf32>
    %362 = tpu.matmul %361, %222, %cst_139 {dimension_numbers = #tpu.dot_dimension_numbers<[1], [0], [0], [1], [0, 0, 1, 1], [], []>} : vector<8x32xbf16>, vector<32x128xbf16>, vector<8x128xf32> -> vector<8x128xf32>
    %363 = arith.addf %360, %362 : vector<8x128xf32>
    %364 = arith.negf %363 : vector<8x128xf32>
    %365 = math.exp %364 : vector<8x128xf32>
    %cst_140 = arith.constant 1.000000e+00 : f32
    %366 = vector.broadcast %cst_140 : f32 to vector<8x128xf32>
    %367 = arith.addf %366, %365 : vector<8x128xf32>
    %368 = arith.divf %366, %367 : vector<8x128xf32>
    %369 = math.tanh %363 : vector<8x128xf32>
    %370 = vector.extract_strided_slice %368 {offsets = [0, 0], sizes = [8, 32], strides = [1, 1]} : vector<8x128xf32> to vector<8x32xf32>
    %371 = vector.extract_strided_slice %368 {offsets = [0, 32], sizes = [8, 32], strides = [1, 1]} : vector<8x128xf32> to vector<8x32xf32>
    %372 = vector.extract_strided_slice %369 {offsets = [0, 64], sizes = [8, 32], strides = [1, 1]} : vector<8x128xf32> to vector<8x32xf32>
    %373 = vector.extract_strided_slice %368 {offsets = [0, 96], sizes = [8, 32], strides = [1, 1]} : vector<8x128xf32> to vector<8x32xf32>
    %374 = arith.mulf %371, %357 : vector<8x32xf32>
    %375 = arith.mulf %370, %372 : vector<8x32xf32>
    %376 = arith.addf %374, %375 : vector<8x32xf32>
    %377 = math.tanh %376 : vector<8x32xf32>
    %378 = arith.mulf %373, %377 : vector<8x32xf32>
    %c0_141 = arith.constant 0 : index
    %c0_142 = arith.constant 0 : index
    %379 = vector.load %arg7[%c0_141, %c0_142] : memref<32x128xf32, #tpu.memory_space<vmem>>, vector<32x128xf32>
    %cst_143 = arith.constant dense<0.000000e+00> : vector<8x128xf32>
    %380 = tpu.matmul %378, %379, %cst_143 {dimension_numbers = #tpu.dot_dimension_numbers<[1], [0], [0], [1], [0, 0, 1, 1], [], []>} : vector<8x32xf32>, vector<32x128xf32>, vector<8x128xf32> -> vector<8x128xf32>
    %c0_144 = arith.constant 0 : index
    %c0_145 = arith.constant 0 : index
    %381 = vector.load %arg8[%c0_144, %c0_145] : memref<1x128xf32, #tpu.memory_space<vmem>>, vector<1x128xf32>
    %382 = vector.broadcast %381 : vector<1x128xf32> to vector<8x128xf32>
    %383 = arith.addf %380, %382 : vector<8x128xf32>
    %c0_146 = arith.constant 0 : index
    %c0_147 = arith.constant 0 : index
    %384 = vector.load %arg11[%c0_146, %c0_147] : memref<8x128xf32, #tpu.memory_space<vmem>>, vector<8x128xf32>
    tpu.vector_store %arg11[%c0_146, %c0_147], %383 {strides = array<i32>} : memref<8x128xf32, #tpu.memory_space<vmem>>, vector<8x128xf32>,
    return
  }
}

</mosaic_0001>

<bundles_post_ra>
// kernel: lstm_model_forward.1
= control target key start
LH: loop header
LB: loop body
LE: loop exit
PB: predicated region body
PF: predicated region fallthrough
CT: control target
= control target key end

     0   :  { %vm52_vm0 = vcmask 1043456   ;;  %vm48_vm1 = vcmask 31744   ;;  %v2659_v0 = vmov 0.0   ;;  %vm2660_vm2 = vmmov 0   ;;  %s2661_s14 = smov 64   ;;  %s2662_s17 = smov 32   ;;  %s3173_s1 = inlined_call_operand.vmem [shape: f32[4,128], index: 1, kind: input, shape index: {}]   ;;  %s3174_s0 = inlined_call_operand.vmem [shape: f32[8,8,4], index: 0, kind: input, shape index: {}]   ;;  %s3175_s2 = inlined_call_operand.vmem [shape: bf16[32,128], index: 2, kind: input, shape index: {}]   ;;  %s3176_s9 = inlined_call_operand.vmem [shape: f32[2,8,32], index: 9, kind: input, shape index: {}]   ;;  %s3177_s3 = inlined_call_operand.vmem [shape: f32[1,128], index: 3, kind: input, shape index: {}]   ;;  %s3178_s10 = inlined_call_operand.vmem [shape: f32[2,8,32], index: 10, kind: input, shape index: {}]   ;;  %s3179_s4 = inlined_call_operand.vmem [shape: f32[32,128], index: 4, kind: input, shape index: {}]   ;;  %s3180_s5 = inlined_call_operand.vmem [shape: bf16[32,128], index: 5, kind: input, shape index: {}]   ;;  %s3181_s6 = inlined_call_operand.vmem [shape: f32[1,128], index: 6, kind: input, shape index: {}]   ;;  %s3182_s7 = inlined_call_operand.vmem [shape: f32[32,128], index: 7, kind: input, shape index: {}]   ;;  %s3183_s8 = inlined_call_operand.vmem [shape: f32[1,128], index: 8, kind: input, shape index: {}]   ;;  %s3184_s11 = inlined_call_operand.vmem [shape: f32[8,128], index: 11, kind: output, shape index: {}]  }
   0x1   :  { %2309 = vmatprep.subr.mxu0 %v2659_v0  ;;  %v2728_v1 = vld [vmem:[%s3173_s1] sm:$0xf]  ;;  %2311 = vmatprep.mubr.msk.f32.mxu0 %vm2660_vm2, %v2659_v0  ;;  %v2161_v3 = vld [vmem:[%s3174_s0 + $0x10] sm:$0xff]  ;;  %v2781_v7 = vld [vmem:[%s3175_s2 + $0x8] sm:$0xff]   ;;  %vm679_vm3 = vcmask 261120  }
   0x2   :  { %v41_v2 = vld [vmem:[%s3174_s0] sm:$0xff]  ;;  %2310 = vmatpush3.msk.msra.mxu0 %vm52_vm0, %v2728_v1  ;;  %2314 = vmatprep.subr.mxu1 %v2659_v0  ;;  %v2173_v5 = vld [vmem:[%s3174_s0 + $0x30] sm:$0xff]  ;;  %v2158_v37 = vld [vmem:[%s3174_s0 + $0x8] sm:$0xff] }
   0x3   :  { %2312 = vmatmul.mubr.msk.f32.vlgmr.msra.gmra.mrb[0].mxu0 %vm48_vm1, %v41_v2  ;;  %2319 = vmatprep.subr.mxu0 %v2659_v0  ;;  %v2167_v4 = vld [vmem:[%s3174_s0 + $0x20] sm:$0xff]  ;;  %v2164_v38 = vld [vmem:[%s3174_s0 + $0x18] sm:$0xff]  ;;  %v2170_v39 = vld [vmem:[%s3174_s0 + $0x28] sm:$0xff] }
   0x4   :  { %2320 = vmatpush3.msk.msra.mxu0 %vm52_vm0, %v2728_v1  ;;  %2321 = vmatprep.mubr.msk.f32.mxu0 %vm2660_vm2, %v2659_v0  ;;  %v2773_v6 = vld [vmem:[%s3175_s2] sm:$0xff]   ;;  %v2176_v41 = vld [vmem:[%s3174_s0 + $0x38] sm:$0xff] }
   0x5   :  { %2329 = vmatprep.subr.mxu0 %v2659_v0  ;;  %2315 = vmatpush3.msk.msra.mxu1 %vm52_vm0, %v2728_v1  ;;  %v663_v8 = vld [vmem:[%s3176_s9] sm:$0xff] }
   0x6   :  { %2316 = vmatprep.mubr.msk.f32.mxu1 %vm2660_vm2, %v2659_v0  ;;  %2324 = vmatprep.subr.mxu1 %v2659_v0  ;;  %v666_v9 = vpack.c.bf16 %v663_v8, %v663_v8  ;;  %v2807_v18 = vld [vmem:[%s3177_s3] ss:$0 sm:$0xff] }
   0x7   :  { %2322 = vmatmul.mubr.msk.f32.vlgmr.msra.gmra.mrb[2].mxu0 %vm48_vm1, %v2161_v3  ;;  %v664_v26 = vld [vmem:[%s3178_s10] sm:$0xff]  ;;  %2317 = vmatmul.mubr.msk.f32.vlgmr.msra.gmra.mrb[0].mxu1 %vm48_vm1, %v2158_v37 }
   0x8   :  { %2330 = vmatpush3.msk.msra.mxu0 %vm52_vm0, %v2728_v1  ;;  %2331 = vmatprep.mubr.msk.f32.mxu0 %vm2660_vm2, %v2659_v0 }
   0x9   :  { %2339 = vmatprep.subr.mxu0 %v2659_v0  ;;  %2325 = vmatpush3.msk.msra.mxu1 %vm52_vm0, %v2728_v1 }
   0xa   :  { %2326 = vmatprep.mubr.msk.f32.mxu1 %vm2660_vm2, %v2659_v0  ;;  %2334 = vmatprep.subr.mxu1 %v2659_v0 }
   0xb   :  { %2332 = vmatmul.mubr.msk.f32.vlgmr.msra.gmra.mrb[4].mxu0 %vm48_vm1, %v2167_v4  ;;  %2327 = vmatmul.mubr.msk.f32.vlgmr.msra.gmra.mrb[2].mxu1 %vm48_vm1, %v2164_v38 }
   0xc   :  { %2340 = vmatpush3.msk.msra.mxu0 %vm52_vm0, %v2728_v1  ;;  %2341 = vmatprep.mubr.msk.f32.mxu0 %vm2660_vm2, %v2659_v0 }
   0xd   :  { %2349 = vmatprep.subr.bf16.mxu0 %v2659_v0  ;;  %2335 = vmatpush3.msk.msra.mxu1 %vm52_vm0, %v2728_v1 }
   0xe   :  { %2336 = vmatprep.mubr.msk.f32.mxu1 %vm2660_vm2, %v2659_v0  ;;  %2344 = vmatprep.subr.mxu1 %v2659_v0 }
   0xf   :  { %2342 = vmatmul.mubr.msk.f32.vlgmr.msra.gmra.mrb[6].mxu0 %vm48_vm1, %v2173_v5  ;;  %2337 = vmatmul.mubr.msk.f32.vlgmr.msra.gmra.mrb[4].mxu1 %vm48_vm1, %v2170_v39 }
  0x10   :  { %2350 = vmatpush3.bf16.msra.mxu0 %v2773_v6  ;;  %2353 = vmatprep.mubr.msk.bf16.mxu0 %vm2660_vm2, %v2659_v0 }
  0x11   :  { %2351 = vmatprep.subr.bf16.mxu0 %v2659_v0  ;;  %2345 = vmatpush3.msk.msra.mxu1 %vm52_vm0, %v2728_v1 }
  0x12   :  { %2346 = vmatprep.mubr.msk.f32.mxu1 %vm2660_vm2, %v2659_v0  ;;  %2357 = vmatprep.subr.bf16.mxu1 %v2659_v0 }
  0x13   :  { %2347 = vmatmul.mubr.msk.f32.vlgmr.msra.gmra.mrb[6].mxu1 %vm48_vm1, %v2176_v41 }
  0x14   :  { %2352 = vmatpush3.bf16.msra.mxu0 %v2781_v7  ;;  %2358 = vmatpush3.bf16.msra.mxu1 %v2773_v6 }
  0x15   :  { %2365 = vmatprep.subr.bf16.mxu0 %v2659_v0  ;;  %2361 = vmatprep.mubr.msk.bf16.mxu1 %vm2660_vm2, %v2659_v0 }
  0x16   :  { %2359 = vmatprep.subr.bf16.mxu1 %v2659_v0 }
  0x17   :  { %2354 = vmatmul.mubr.msk.bf16.vlgmr.msra.gmra.mrb[8].mxu0 %vm679_vm3, %v666_v9 }
  0x18   :  { %2366 = vmatpush3.bf16.msra.mxu0 %v2773_v6  ;;  %2369 = vmatprep.mubr.msk.bf16.mxu0 %vm2660_vm2, %v2659_v0 }
  0x19   :  { %2367 = vmatprep.subr.bf16.mxu0 %v2659_v0  ;;  %2360 = vmatpush3.bf16.msra.mxu1 %v2781_v7 }
  0x1a   :  { %2373 = vmatprep.subr.bf16.mxu1 %v2659_v0 }
  0x1c   :  { %2368 = vmatpush3.bf16.msra.mxu0 %v2781_v7 }
  0x1d   :  { %2381 = vmatprep.subr.bf16.mxu0 %v2659_v0 }
  0xd6   :  { %v122_v10 = vpop.f32.mrb[0].mxu0 }
  0xd7   :  { %v2313_v11 = vpop.f32.mrb[1].mxu0  ;;  %v123_v19 = vadd.f32 %v2807_v18, %v122_v10 }
  0xda   :  { %v2798_v12 = vpop.f32.mrb[2].mxu0  ;;  %v198_v45 = vpop.f32.mrb[0].mxu1 }
  0xdb   :  { %v2323_v13 = vpop.f32.mrb[3].mxu0  ;;  %v2318_v46 = vpop.f32.mrb[1].mxu1  ;;  %v199_v54 = vadd.f32 %v2807_v18, %v198_v45 }
  0xde   :  { %v2800_v14 = vpop.f32.mrb[4].mxu0  ;;  %v2862_v47 = vpop.f32.mrb[2].mxu1 }
  0xdf   :  { %v2333_v15 = vpop.f32.mrb[5].mxu0  ;;  %v2328_v48 = vpop.f32.mrb[3].mxu1  ;;  %v351_v38 = vadd.f32 %v2807_v18, %v2862_v47 }
  0xe2   :  { %v2802_v16 = vpop.f32.mrb[6].mxu0  ;;  %v2864_v49 = vpop.f32.mrb[4].mxu1 }
  0xe3   :  { %v2343_v17 = vpop.f32.mrb[7].mxu0  ;;  %v2338_v50 = vpop.f32.mrb[5].mxu1 }
  0xe4   :  { %v275_v17 = vadd.f32 %v2807_v18, %v2798_v12 }
  0xe6   :  { %v2866_v51 = vpop.f32.mrb[6].mxu1 }
  0xe7   :  { %v2348_v52 = vpop.f32.mrb[7].mxu1 }
  0xea   :  { %v717_v20 = vpop.f32.mrb[8].mxu0 }
  0xeb   :  { %v723_v21 = vadd.f32 %v717_v20, %v123_v19  ;;  %v2355_v22 = vpop.f32.mrb[9].mxu0 }
  0xec   :  { %v720_v23 = vpop.f32.mrb[10].mxu0 }
  0xed   :  { %2531 = vtanh.f32 %v723_v21  ;;  %v2356_v24 = vpop.f32.mrb[11].mxu0  ;;  %v2182_v27 = vmul.f32 -1.442695, %v723_v21 }
  0xef   :  { %2533 = vpow2.f32 %v2182_v27 }
  0xf7   :  { %v2532_v25 = vpop.eup %2531 }
  0xf8   :  { %737 = vrot.lane.b32.xlu0 %v2532_v25, %s2661_s14 }
  0xf9   :  { %v2534_v28 = vpop.eup %2533 }
  0xfa   :  { %v727_v29 = vadd.f32 1.0, %v2534_v28 }
  0xfc   :  { %732 = vrot.lane.b32.xlu0 %v664_v26, %s2662_s17  ;;  %2535 = vrcp.f32 %v727_v29 }
 0x106   :  { %v2536_v30 = vpop.eup %2535 }
 0x16a   :  { %v738_v31 = vpop.permute.xlu0 %737 }
 0x16b   :  { %v740_v32 = vmul.f32 %v2536_v30, %v738_v31 }
 0x16d   :  { %742 = vrot.lane.b32.xlu1 %v740_v32, %s2662_s17 }
 0x16e   :  { %v733_v33 = vpop.permute.xlu0 %732 }
 0x16f   :  { %v735_v34 = vmul.f32 %v2536_v30, %v733_v33 }
 0x1df   :  { %v743_v35 = vpop.permute.xlu1 %742 }
 0x1e0   :  { %v2816_v36 = vadd.f32 %v743_v35, %v735_v34 }
 0x1e2   :  { %2537 = vtanh.f32 %v2816_v36 }
 0x1ec   :  { %v2538_v40 = vpop.eup %2537 }
 0x1ed   :  { %748 = vrot.lane.b32.xlu1 %v2538_v40, %s2661_s14 }
 0x25f   :  { %v749_v42 = vpop.permute.xlu1 %748 }
 0x260   :  { %v2857_v43 = vmul.f32 %v2536_v30, %v749_v42 }
 0x262   :  { %v758_v44 = vpack.c.bf16 %v2857_v43, %v2857_v43 }
 0x264   :  { %760 = vrot.lane.b32.xlu0 %v758_v44, %s2662_s17 }
 0x2d6   :  { %v761_v53 = vpop.permute.xlu0 %760 }
 0x2d7   :  { %2362 = vmatmul.mubr.msk.bf16.vlgmr.msra.gmra.mrb[8].mxu1 %vm679_vm3, %v761_v53 }
 0x2d8   :  { %2374 = vmatpush3.bf16.msra.mxu1 %v2773_v6  ;;  %2377 = vmatprep.mubr.msk.bf16.mxu1 %vm2660_vm2, %v2659_v0 }
 0x2d9   :  { %2375 = vmatprep.subr.bf16.mxu1 %v2659_v0 }
 0x2dc   :  { %2376 = vmatpush3.bf16.msra.mxu1 %v2781_v7 }
 0x2dd   :  { %2389 = vmatprep.subr.bf16.mxu1 %v2659_v0 }
 0x3aa   :  { %v799_v55 = vpop.f32.mrb[8].mxu1 }
 0x3ab   :  { %v805_v56 = vadd.f32 %v799_v55, %v199_v54  ;;  %v2363_v57 = vpop.f32.mrb[9].mxu1 }
 0x3ac   :  { %v802_v58 = vpop.f32.mrb[10].mxu1 }
 0x3ad   :  { %2539 = vtanh.f32 %v805_v56  ;;  %v2364_v59 = vpop.f32.mrb[11].mxu1  ;;  %v2184_v61 = vmul.f32 -1.442695, %v805_v56 }
 0x3af   :  { %2541 = vpow2.f32 %v2184_v61 }
 0x3b7   :  { %v2540_v60 = vpop.eup %2539 }
 0x3b8   :  { %815 = vrot.lane.b32.xlu1 %v2540_v60, %s2661_s14 }
 0x3b9   :  { %v2542_v62 = vpop.eup %2541 }
 0x3ba   :  { %v809_v63 = vadd.f32 1.0, %v2542_v62  ;;  %v427_v62 = vadd.f32 %v2807_v18, %v2800_v14 }
 0x3bc   :  { %2543 = vrcp.f32 %v809_v63 }
 0x3c6   :  { %v2544_v1 = vpop.eup %2543 }
 0x3c7   :  { %v813_v4 = vmul.f32 %v2544_v1, %v2816_v36 }
 0x42a   :  { %v816_v2 = vpop.permute.xlu1 %815 }
 0x42b   :  { %v818_v3 = vmul.f32 %v2544_v1, %v816_v2 }
 0x42d   :  { %820 = vrot.lane.b32.xlu0 %v818_v3, %s2662_s17 }
 0x49f   :  { %v821_v5 = vpop.permute.xlu0 %820 }
 0x4a0   :  { %v823_v8 = vadd.f32 %v821_v5, %v813_v4 }
 0x4a2   :  { %2545 = vtanh.f32 %v823_v8 }
 0x4ac   :  { %v2546_v9 = vpop.eup %2545 }
 0x4ad   :  { %826 = vrot.lane.b32.xlu1 %v2546_v9, %s2661_s14 }
 0x51f   :  { %v827_v10 = vpop.permute.xlu1 %826 }
 0x520   :  { %v2880_v11 = vmul.f32 %v2544_v1, %v827_v10 }
 0x522   :  { %v836_v13 = vpack.c.bf16 %v2880_v11, %v2880_v11 }
 0x524   :  { %838 = vrot.lane.b32.xlu0 %v836_v13, %s2662_s17 }
 0x596   :  { %v839_v15 = vpop.permute.xlu0 %838 }
 0x597   :  { %2370 = vmatmul.mubr.msk.bf16.vlgmr.msra.gmra.mrb[12].mxu0 %vm679_vm3, %v839_v15 }
 0x598   :  { %2382 = vmatpush3.bf16.msra.mxu0 %v2773_v6  ;;  %2385 = vmatprep.mubr.msk.bf16.mxu0 %vm2660_vm2, %v2659_v0 }
 0x599   :  { %2383 = vmatprep.subr.bf16.mxu0 %v2659_v0 }
 0x59c   :  { %2384 = vmatpush3.bf16.msra.mxu0 %v2781_v7 }
 0x59d   :  { %2397 = vmatprep.subr.bf16.mxu0 %v2659_v0 }
 0x66a   :  { %v877_v19 = vpop.f32.mrb[12].mxu0 }
 0x66b   :  { %v883_v20 = vadd.f32 %v877_v19, %v275_v17  ;;  %v2371_v21 = vpop.f32.mrb[13].mxu0 }
 0x66c   :  { %v880_v22 = vpop.f32.mrb[14].mxu0 }
 0x66d   :  { %2547 = vtanh.f32 %v883_v20  ;;  %v2372_v23 = vpop.f32.mrb[15].mxu0  ;;  %v2186_v25 = vmul.f32 -1.442695, %v883_v20 }
 0x66f   :  { %2549 = vpow2.f32 %v2186_v25 }
 0x677   :  { %v2548_v24 = vpop.eup %2547 }
 0x678   :  { %893 = vrot.lane.b32.xlu1 %v2548_v24, %s2661_s14 }
 0x679   :  { %v2550_v26 = vpop.eup %2549 }
 0x67a   :  { %v887_v27 = vadd.f32 1.0, %v2550_v26  ;;  %v503_v26 = vadd.f32 %v2807_v18, %v2864_v49 }
 0x67c   :  { %2551 = vrcp.f32 %v887_v27 }
 0x686   :  { %v2552_v28 = vpop.eup %2551 }
 0x687   :  { %v891_v12 = vmul.f32 %v2552_v28, %v823_v8 }
 0x6ea   :  { %v894_v29 = vpop.permute.xlu1 %893 }
 0x6eb   :  { %v896_v30 = vmul.f32 %v2552_v28, %v894_v29 }
 0x6ed   :  { %898 = vrot.lane.b32.xlu0 %v896_v30, %s2662_s17 }
 0x75f   :  { %v899_v31 = vpop.permute.xlu0 %898 }
 0x760   :  { %v901_v32 = vadd.f32 %v899_v31, %v891_v12 }
 0x762   :  { %2553 = vtanh.f32 %v901_v32 }
 0x76c   :  { %v2554_v33 = vpop.eup %2553 }
 0x76d   :  { %904 = vrot.lane.b32.xlu1 %v2554_v33, %s2661_s14 }
 0x7df   :  { %v905_v34 = vpop.permute.xlu1 %904 }
 0x7e0   :  { %v2897_v35 = vmul.f32 %v2552_v28, %v905_v34 }
 0x7e2   :  { %v914_v36 = vpack.c.bf16 %v2897_v35, %v2897_v35 }
 0x7e4   :  { %916 = vrot.lane.b32.xlu0 %v914_v36, %s2662_s17 }
 0x856   :  { %v917_v37 = vpop.permute.xlu0 %916 }
 0x857   :  { %2378 = vmatmul.mubr.msk.bf16.vlgmr.msra.gmra.mrb[12].mxu1 %vm679_vm3, %v917_v37 }
 0x858   :  { %2390 = vmatpush3.bf16.msra.mxu1 %v2773_v6  ;;  %2393 = vmatprep.mubr.msk.bf16.mxu1 %vm2660_vm2, %v2659_v0 }
 0x859   :  { %2391 = vmatprep.subr.bf16.mxu1 %v2659_v0 }
 0x85c   :  { %2392 = vmatpush3.bf16.msra.mxu1 %v2781_v7 }
 0x85d   :  { %2405 = vmatprep.subr.bf16.mxu1 %v2659_v0 }
 0x92a   :  { %v955_v39 = vpop.f32.mrb[12].mxu1 }
 0x92b   :  { %v961_v40 = vadd.f32 %v955_v39, %v351_v38  ;;  %v2379_v41 = vpop.f32.mrb[13].mxu1 }
 0x92c   :  { %v958_v42 = vpop.f32.mrb[14].mxu1 }
 0x92d   :  { %2555 = vtanh.f32 %v961_v40  ;;  %v2380_v44 = vpop.f32.mrb[15].mxu1  ;;  %v2188_v46 = vmul.f32 -1.442695, %v961_v40 }
 0x92f   :  { %2557 = vpow2.f32 %v2188_v46 }
 0x937   :  { %v2556_v45 = vpop.eup %2555 }
 0x938   :  { %971 = vrot.lane.b32.xlu1 %v2556_v45, %s2661_s14  ;;  %v579_v45 = vadd.f32 %v2807_v18, %v2802_v16 }
 0x939   :  { %v2558_v48 = vpop.eup %2557 }
 0x93a   :  { %v965_v50 = vadd.f32 1.0, %v2558_v48 }
 0x93c   :  { %2559 = vrcp.f32 %v965_v50 }
 0x946   :  { %v2560_v52 = vpop.eup %2559 }
 0x947   :  { %v969_v47 = vmul.f32 %v2560_v52, %v901_v32 }
 0x9aa   :  { %v972_v53 = vpop.permute.xlu1 %971 }
 0x9ab   :  { %v974_v54 = vmul.f32 %v2560_v52, %v972_v53 }
 0x9ad   :  { %976 = vrot.lane.b32.xlu0 %v974_v54, %s2662_s17 }
 0xa1f   :  { %v977_v55 = vpop.permute.xlu0 %976 }
 0xa20   :  { %v979_v56 = vadd.f32 %v977_v55, %v969_v47 }
 0xa22   :  { %2561 = vtanh.f32 %v979_v56 }
 0xa2c   :  { %v2562_v57 = vpop.eup %2561 }
 0xa2d   :  { %982 = vrot.lane.b32.xlu1 %v2562_v57, %s2661_s14 }
 0xa9f   :  { %v983_v58 = vpop.permute.xlu1 %982 }
 0xaa0   :  { %v2914_v59 = vmul.f32 %v2560_v52, %v983_v58 }
 0xaa2   :  { %v992_v60 = vpack.c.bf16 %v2914_v59, %v2914_v59 }
 0xaa4   :  { %994 = vrot.lane.b32.xlu0 %v992_v60, %s2662_s17 }
 0xb16   :  { %v995_v61 = vpop.permute.xlu0 %994 }
 0xb17   :  { %2386 = vmatmul.mubr.msk.bf16.vlgmr.msra.gmra.mrb[16].mxu0 %vm679_vm3, %v995_v61 }
 0xb18   :  { %2398 = vmatpush3.bf16.msra.mxu0 %v2773_v6  ;;  %2401 = vmatprep.mubr.msk.bf16.mxu0 %vm2660_vm2, %v2659_v0 }
 0xb19   :  { %2399 = vmatprep.subr.bf16.mxu0 %v2659_v0 }
 0xb1c   :  { %2400 = vmatpush3.bf16.msra.mxu0 %v2781_v7 }
 0xbea   :  { %v1033_v63 = vpop.f32.mrb[16].mxu0 }
 0xbeb   :  { %v1039_v1 = vadd.f32 %v1033_v63, %v427_v62  ;;  %v2387_v2 = vpop.f32.mrb[17].mxu0  ;;  %v1303_v63 = vld [vmem:[%s3179_s4] sm:$0xff] }
 0xbec   :  { %v1036_v3 = vpop.f32.mrb[18].mxu0 }
 0xbed   :  { %2563 = vtanh.f32 %v1039_v1  ;;  %v2388_v4 = vpop.f32.mrb[19].mxu0  ;;  %v2190_v8 = vmul.f32 -1.442695, %v1039_v1  ;;  %v1304_v1 = vld [vmem:[%s3179_s4 + $0x8] sm:$0xff] }
 0xbee   :  { %v2508_v2 = vpack.c.bf16 %v1304_v1, %v1303_v63  ;;  %v1306_v4 = vld [vmem:[%s3179_s4 + $0x18] sm:$0xff] }
 0xbef   :  { %2565 = vpow2.f32 %v2190_v8 }
 0xbf0   :  { %2509 = vmatprep.subr.bf16.mxu0 %v2508_v2 }
 0xbf7   :  { %v2564_v5 = vpop.eup %2563 }
 0xbf8   :  { %1049 = vrot.lane.b32.xlu1 %v2564_v5, %s2661_s14 }
 0xbf9   :  { %v2566_v9 = vpop.eup %2565 }
 0xbfa   :  { %v1043_v10 = vadd.f32 1.0, %v2566_v9 }
 0xbfc   :  { %2567 = vrcp.f32 %v1043_v10 }
 0xc06   :  { %v2568_v13 = vpop.eup %2567 }
 0xc07   :  { %v1047_v14 = vmul.f32 %v2568_v13, %v979_v56 }
 0xc6a   :  { %v1050_v15 = vpop.permute.xlu1 %1049 }
 0xc6b   :  { %v1052_v17 = vmul.f32 %v2568_v13, %v1050_v15 }
 0xc6d   :  { %1054 = vrot.lane.b32.xlu0 %v1052_v17, %s2662_s17 }
 0xcdf   :  { %v1055_v19 = vpop.permute.xlu0 %1054 }
 0xce0   :  { %v1057_v20 = vadd.f32 %v1055_v19, %v1047_v14  ;;  %v2989_v19 = vld [vmem:[%s3180_s5] sm:$0xff]  }
 0xce2   :  { %2569 = vtanh.f32 %v1057_v20 }
 0xcec   :  { %v2570_v21 = vpop.eup %2569 }
 0xced   :  { %1060 = vrot.lane.b32.xlu1 %v2570_v21, %s2661_s14 }
 0xd5f   :  { %v1061_v22 = vpop.permute.xlu1 %1060 }
 0xd60   :  { %v2930_v23 = vmul.f32 %v2568_v13, %v1061_v22  ;;  %v2206_v22 = vld [vmem:[%s3176_s9 + $0x8] sm:$0xff] }
 0xd62   :  { %v1070_v24 = vpack.c.bf16 %v2930_v23, %v2930_v23 }
 0xd64   :  { %1072 = vrot.lane.b32.xlu0 %v1070_v24, %s2662_s17  ;;  %v1468_v24 = vpack.c.bf16 %v2206_v22, %v2206_v22 }
 0xdd6   :  { %v1073_v25 = vpop.permute.xlu0 %1072 }
 0xdd7   :  { %2394 = vmatmul.mubr.msk.bf16.vlgmr.msra.gmra.mrb[16].mxu1 %vm679_vm3, %v1073_v25 }
 0xdd8   :  { %2406 = vmatpush3.bf16.msra.mxu1 %v2773_v6  ;;  %2409 = vmatprep.mubr.msk.bf16.mxu1 %vm2660_vm2, %v2659_v0 }
 0xdd9   :  { %2407 = vmatprep.subr.bf16.mxu1 %v2659_v0 }
 0xddc   :  { %2408 = vmatpush3.bf16.msra.mxu1 %v2781_v7 }
 0xddd   :  { %2433 = vmatprep.subr.bf16.mxu1 %v2659_v0 }
 0xeaa   :  { %v1111_v27 = vpop.f32.mrb[16].mxu1 }
 0xeab   :  { %v1117_v28 = vadd.f32 %v1111_v27, %v503_v26  ;;  %v2395_v29 = vpop.f32.mrb[17].mxu1  ;;  %v655_v27 = vadd.f32 %v2807_v18, %v2866_v51 }
 0xeac   :  { %v1114_v30 = vpop.f32.mrb[18].mxu1 }
 0xead   :  { %2571 = vtanh.f32 %v1117_v28  ;;  %v2396_v12 = vpop.f32.mrb[19].mxu1  ;;  %v2192_v6 = vmul.f32 -1.442695, %v1117_v28 }
 0xeaf   :  { %2573 = vpow2.f32 %v2192_v6  ;;  %v3029_v6 = vld [vmem:[%s3181_s6] ss:$0 sm:$0xff] }
 0xeb7   :  { %v2572_v31 = vpop.eup %2571 }
 0xeb8   :  { %1127 = vrot.lane.b32.xlu1 %v2572_v31, %s2661_s14 }
 0xeb9   :  { %v2574_v32 = vpop.eup %2573 }
 0xeba   :  { %v1121_v33 = vadd.f32 1.0, %v2574_v32 }
 0xebc   :  { %2575 = vrcp.f32 %v1121_v33 }
 0xec6   :  { %v2576_v7 = vpop.eup %2575 }
 0xec7   :  { %v1125_v49 = vmul.f32 %v2576_v7, %v1057_v20  ;;  %v2207_v20 = vld [vmem:[%s3178_s10 + $0x8] sm:$0xff] }
 0xf2a   :  { %v1128_v34 = vpop.permute.xlu1 %1127 }
 0xf2b   :  { %v1130_v36 = vmul.f32 %v2576_v7, %v1128_v34 }
 0xf2d   :  { %1132 = vrot.lane.b32.xlu0 %v1130_v36, %s2662_s17 }
 0xf9f   :  { %v1133_v37 = vpop.permute.xlu0 %1132 }
 0xfa0   :  { %v1135_v38 = vadd.f32 %v1133_v37, %v1125_v49 }
 0xfa2   :  { %2577 = vtanh.f32 %v1135_v38 }
 0xfac   :  { %v2578_v39 = vpop.eup %2577 }
 0xfad   :  { %1138 = vrot.lane.b32.xlu1 %v2578_v39, %s2661_s14 }
0x101f   :  { %v1139_v40 = vpop.permute.xlu1 %1138 }
0x1020   :  { %v2947_v41 = vmul.f32 %v2576_v7, %v1139_v40 }
0x1022   :  { %v1148_v42 = vpack.c.bf16 %v2947_v41, %v2947_v41 }
0x1024   :  { %1150 = vrot.lane.b32.xlu0 %v1148_v42, %s2662_s17 }
0x1096   :  { %v1151_v44 = vpop.permute.xlu0 %1150 }
0x1097   :  { %2402 = vmatmul.mubr.msk.bf16.vlgmr.msra.gmra.mrb[20].mxu0 %vm679_vm3, %v1151_v44 }
0x1098   :  { %2511 = vmatpush3.bf16.msra.mxu0 %v2508_v2 }
0x116a   :  { %v1189_v46 = vpop.f32.mrb[20].mxu0 }
0x116b   :  { %v1195_v48 = vadd.f32 %v1189_v46, %v579_v45  ;;  %v2403_v50 = vpop.f32.mrb[21].mxu0 }
0x116c   :  { %v1192_v52 = vpop.f32.mrb[22].mxu0 }
0x116d   :  { %2579 = vtanh.f32 %v1195_v48  ;;  %v2404_v53 = vpop.f32.mrb[23].mxu0  ;;  %v2194_v47 = vmul.f32 -1.442695, %v1195_v48 }
0x116f   :  { %2581 = vpow2.f32 %v2194_v47 }
0x1177   :  { %v2580_v54 = vpop.eup %2579 }
0x1178   :  { %1205 = vrot.lane.b32.xlu1 %v2580_v54, %s2661_s14 }
0x1179   :  { %v2582_v55 = vpop.eup %2581 }
0x117a   :  { %v1199_v56 = vadd.f32 1.0, %v2582_v55 }
0x117c   :  { %2583 = vrcp.f32 %v1199_v56 }
0x1186   :  { %v2584_v57 = vpop.eup %2583 }
0x1187   :  { %v1203_v16 = vmul.f32 %v2584_v57, %v1135_v38 }
0x11ea   :  { %v1206_v58 = vpop.permute.xlu1 %1205 }
0x11eb   :  { %v1208_v60 = vmul.f32 %v2584_v57, %v1206_v58 }
0x11ed   :  { %1210 = vrot.lane.b32.xlu0 %v1208_v60, %s2662_s17 }
0x11f1   :  { %753 = vrot.lane.b32.xlu0 %v2857_v43, %s2662_s17  ;;  %v1305_v43 = vld [vmem:[%s3179_s4 + $0x10] sm:$0xff] }
0x11f2   :  { %v2512_v5 = vpack.c.bf16 %v1306_v4, %v1305_v43 }
0x11f4   :  { %2513 = vmatprep.subr.bf16.mxu0 %v2512_v5 }
0x11f5   :  { %2515 = vmatpush3.bf16.msra.mxu0 %v2512_v5 }
0x11f6   :  { %2449 = vmatprep.subr.bf16.mxu0 %v2659_v0 }
0x125f   :  { %v1211_v61 = vpop.permute.xlu0 %1210 }
0x1260   :  { %v2959_v62 = vadd.f32 %v1211_v61, %v1203_v16 }
0x1262   :  { %2585 = vtanh.f32 %v2959_v62 }
0x1263   :  { %v754_v3 = vpop.permute.xlu0 %753 }
0x1264   :  { %756 = vst.msk [vmem:[#allocation3] sm:$0xff] %vm679_vm3, %v754_v3 }
0x126b   :  { %v1308_v8 = vld [vmem:[#allocation3] sm:$0xff] }
0x126c   :  { %v2586_v9 = vpop.eup %2585  ;;  %2421 = vmatprep.mubr.msk.f32.mxu0 %vm679_vm3, %v1308_v8 }
0x126d   :  { %1216 = vrot.lane.b32.xlu1 %v2586_v9, %s2661_s14 }
0x1271   :  { %831 = vrot.lane.b32.xlu1 %v2880_v11, %s2662_s17  ;;  %v2997_v11 = vld [vmem:[%s3180_s5 + $0x8] sm:$0xff]  }
0x12df   :  { %v1217_v10 = vpop.permute.xlu1 %1216 }
0x12e0   :  { %v2980_v13 = vmul.f32 %v2584_v57, %v1217_v10 }
0x12e2   :  { %v1226_v15 = vpack.c.bf16 %v2980_v13, %v2980_v13 }
0x12e3   :  { %v832_v17 = vpop.permute.xlu1 %831 }
0x12e4   :  { %834 = vst.msk [vmem:[#allocation3 + $0x8] sm:$0xff] %vm679_vm3, %v832_v17  ;;  %1228 = vrot.lane.b32.xlu0 %v1226_v15, %s2662_s17 }
0x12e8   :  { %1533 = vrot.lane.b32.xlu0 %v2207_v20, %s2662_s17 }
0x12eb   :  { %v1309_v14 = vld [vmem:[#allocation3 + $0x8] sm:$0xff] }
0x12ec   :  { %2422 = vmatmul.mubr.msk.f32.vlgmr.msra.gmra.mrb[24].mxu0 %vm679_vm3, %v1309_v14 }
0x12ed   :  { %2450 = vmatpush3.bf16.msra.mxu0 %v2989_v19 }
0x12ee   :  { %2451 = vmatprep.subr.bf16.mxu0 %v2659_v0 }
0x12f1   :  { %2452 = vmatpush3.bf16.msra.mxu0 %v2997_v11 }
0x12f2   :  { %2465 = vmatprep.subr.bf16.mxu0 %v2659_v0 }
0x1356   :  { %v1229_v21 = vpop.permute.xlu0 %1228 }
0x1357   :  { %2410 = vmatmul.mubr.msk.bf16.vlgmr.msra.gmra.mrb[20].mxu1 %vm679_vm3, %v1229_v21 }
0x1358   :  { %2434 = vmatpush3.bf16.msra.mxu1 %v2989_v19  ;;  %2437 = vmatprep.mubr.msk.bf16.mxu1 %vm2660_vm2, %v2659_v0 }
0x1359   :  { %2435 = vmatprep.subr.bf16.mxu1 %v2659_v0 }
0x135a   :  { %v1534_v44 = vpop.permute.xlu0 %1533 }
0x135c   :  { %2436 = vmatpush3.bf16.msra.mxu1 %v2997_v11 }
0x135d   :  { %2441 = vmatprep.subr.bf16.mxu1 %v2659_v0 }
0x135f   :  { %2438 = vmatmul.mubr.msk.bf16.vlgmr.msra.gmra.mrb[24].mxu1 %vm679_vm3, %v1468_v24 }
0x1360   :  { %2442 = vmatpush3.bf16.msra.mxu1 %v2989_v19  ;;  %2445 = vmatprep.mubr.msk.bf16.mxu1 %vm2660_vm2, %v2659_v0 }
0x1361   :  { %2443 = vmatprep.subr.bf16.mxu1 %v2659_v0 }
0x1364   :  { %2444 = vmatpush3.bf16.msra.mxu1 %v2997_v11 }
0x1365   :  { %2457 = vmatprep.subr.bf16.mxu1 %v2659_v0 }
0x13bf   :  { %v3022_v25 = vpop.f32.mrb[24].mxu0 }
0x13c0   :  { %v1412_v26 = vpop.f32.mrb[25].mxu0 }
0x13c1   :  { %v1413_v32 = vadd.f32 %v3029_v6, %v1412_v26 }
0x142a   :  { %v1267_v28 = vpop.f32.mrb[20].mxu1 }
0x142b   :  { %v1273_v29 = vadd.f32 %v1267_v28, %v655_v27  ;;  %v2411_v30 = vpop.f32.mrb[21].mxu1 }
0x142c   :  { %v1270_v12 = vpop.f32.mrb[22].mxu1 }
0x142d   :  { %v2412_v31 = vpop.f32.mrb[23].mxu1  ;;  %v2196_v53 = vmul.f32 -1.442695, %v1273_v29 }
0x1432   :  { %v1518_v33 = vpop.f32.mrb[24].mxu1 }
0x1433   :  { %v1524_v7 = vadd.f32 %v1518_v33, %v1413_v32  ;;  %v2439_v34 = vpop.f32.mrb[25].mxu1 }
0x1434   :  { %v1521_v36 = vpop.f32.mrb[26].mxu1 }
0x1435   :  { %2587 = vtanh.f32 %v1524_v7  ;;  %v2440_v49 = vpop.f32.mrb[27].mxu1  ;;  %v2211_v18 = vmul.f32 -1.442695, %v1524_v7 }
0x1437   :  { %2589 = vpow2.f32 %v2211_v18 }
0x143f   :  { %v2588_v37 = vpop.eup %2587 }
0x1440   :  { %1538 = vrot.lane.b32.xlu1 %v2588_v37, %s2661_s14 }
0x1441   :  { %v2590_v51 = vpop.eup %2589 }
0x1442   :  { %v1528_v38 = vadd.f32 1.0, %v2590_v51 }
0x1444   :  { %2591 = vrcp.f32 %v1528_v38 }
0x144e   :  { %v2592_v39 = vpop.eup %2591 }
0x144f   :  { %v1536_v45 = vmul.f32 %v2592_v39, %v1534_v44 }
0x14b2   :  { %v1539_v40 = vpop.permute.xlu1 %1538 }
0x14b3   :  { %v1541_v42 = vmul.f32 %v2592_v39, %v1539_v40 }
0x14b5   :  { %1543 = vrot.lane.b32.xlu1 %v1541_v42, %s2662_s17 }
0x1527   :  { %v1544_v46 = vpop.permute.xlu1 %1543 }
0x1528   :  { %v3034_v48 = vadd.f32 %v1544_v46, %v1536_v45 }
0x152a   :  { %2593 = vtanh.f32 %v3034_v48 }
0x152b   :  { %2595 = vtanh.f32 %v1273_v29 }
0x152c   :  { %2597 = vpow2.f32 %v2196_v53 }
0x1534   :  { %v2594_v50 = vpop.eup %2593 }
0x1535   :  { %1549 = vrot.lane.b32.xlu0 %v2594_v50, %s2661_s14  ;;  %v2596_v52 = vpop.eup %2595 }
0x1536   :  { %v2598_v54 = vpop.eup %2597 }
0x1537   :  { %v1277_v47 = vadd.f32 1.0, %v2598_v54 }
0x1539   :  { %1283 = vrot.lane.b32.xlu0 %v2596_v52, %s2661_s14  ;;  %2599 = vrcp.f32 %v1277_v47 }
0x1543   :  { %v2600_v58 = vpop.eup %2599 }
0x1544   :  { %v1281_v63 = vmul.f32 %v2600_v58, %v2959_v62 }
0x15a7   :  { %v1550_v55 = vpop.permute.xlu0 %1549 }
0x15a8   :  { %v1552_v56 = vmul.f32 %v2592_v39, %v1550_v55 }
0x15aa   :  { %v1554_v57 = vpack.c.bf16 %v1552_v56, %v1552_v56 }
0x15ab   :  { %v1284_v60 = vpop.permute.xlu0 %1283 }
0x15ac   :  { %v1286_v16 = vmul.f32 %v2600_v58, %v1284_v60  ;;  %1556 = vrot.lane.b32.xlu1 %v1554_v57, %s2662_s17 }
0x15ae   :  { %1288 = vrot.lane.b32.xlu0 %v1286_v16, %s2662_s17 }
0x161e   :  { %v1557_v61 = vpop.permute.xlu1 %1556 }
0x161f   :  { %2446 = vmatmul.mubr.msk.bf16.vlgmr.msra.gmra.mrb[28].mxu1 %vm679_vm3, %v1557_v61 }
0x1620   :  { %v1289_v1 = vpop.permute.xlu0 %1288  ;;  %2458 = vmatpush3.bf16.msra.mxu1 %v2989_v19  ;;  %2461 = vmatprep.mubr.msk.bf16.mxu1 %vm2660_vm2, %v2659_v0 }
0x1621   :  { %v1291_v2 = vadd.f32 %v1289_v1, %v1281_v63  ;;  %2459 = vmatprep.subr.bf16.mxu1 %v2659_v0 }
0x1623   :  { %2601 = vtanh.f32 %v1291_v2 }
0x1624   :  { %2460 = vmatpush3.bf16.msra.mxu1 %v2997_v11 }
0x1625   :  { %2473 = vmatprep.subr.bf16.mxu1 %v2659_v0 }
0x162d   :  { %v2602_v3 = vpop.eup %2601 }
0x162e   :  { %1294 = vrot.lane.b32.xlu0 %v2602_v3, %s2661_s14 }
0x1632   :  { %909 = vrot.lane.b32.xlu0 %v2897_v35, %s2662_s17  ;;  %v1418_v35 = vadd.f32 %v3022_v25, %v3029_v6 }
0x1636   :  { %1065 = vrot.lane.b32.xlu0 %v2930_v23, %s2662_s17 }
0x163a   :  { %1221 = vrot.lane.b32.xlu0 %v2980_v13, %s2662_s17 }
0x16a0   :  { %v1295_v62 = vpop.permute.xlu0 %1294 }
0x16a1   :  { %v1297_v30 = vmul.f32 %v2600_v58, %v1295_v62 }
0x16a4   :  { %v910_v43 = vpop.permute.xlu0 %909 }
0x16a5   :  { %912 = vst.msk [vmem:[#allocation3 + $0x10] sm:$0xff] %vm679_vm3, %v910_v43 }
0x16a8   :  { %v1066_v4 = vpop.permute.xlu0 %1065 }
0x16a9   :  { %1068 = vst.msk [vmem:[#allocation3 + $0x20] sm:$0xff] %vm679_vm3, %v1066_v4 }
0x16ac   :  { %v1222_v5 = vpop.permute.xlu0 %1221  ;;  %v1310_v8 = vld [vmem:[#allocation3 + $0x10] sm:$0xff] }
0x16ad   :  { %1224 = vst.msk [vmem:[#allocation3 + $0x30] sm:$0xff] %vm679_vm3, %v1222_v5  ;;  %2424 = vmatprep.mubr.msk.f32.mxu0 %vm679_vm3, %v1310_v8 }
0x16b4   :  { %v1314_v49 = vld [vmem:[#allocation3 + $0x30] sm:$0xff] }
0x16f2   :  { %v1595_v23 = vpop.f32.mrb[28].mxu1 }
0x16f3   :  { %v1601_v9 = vadd.f32 %v1595_v23, %v1418_v35  ;;  %v2447_v10 = vpop.f32.mrb[29].mxu1 }
0x16f4   :  { %v1598_v13 = vpop.f32.mrb[30].mxu1 }
0x16f5   :  { %2603 = vtanh.f32 %v1601_v9  ;;  %v2448_v15 = vpop.f32.mrb[31].mxu1  ;;  %v2213_v14 = vmul.f32 -1.442695, %v1601_v9 }
0x16f7   :  { %2605 = vpow2.f32 %v2213_v14 }
0x16ff   :  { %v2604_v17 = vpop.eup %2603 }
0x1700   :  { %1611 = vrot.lane.b32.xlu1 %v2604_v17, %s2661_s14 }
0x1701   :  { %v2606_v20 = vpop.eup %2605 }
0x1702   :  { %v1605_v21 = vadd.f32 1.0, %v2606_v20 }
0x1704   :  { %2607 = vrcp.f32 %v1605_v21 }
0x170e   :  { %v2608_v22 = vpop.eup %2607 }
0x170f   :  { %v1609_v25 = vmul.f32 %v2608_v22, %v3034_v48 }
0x1772   :  { %v1612_v24 = vpop.permute.xlu1 %1611 }
0x1773   :  { %v1614_v26 = vmul.f32 %v2608_v22, %v1612_v24 }
0x1775   :  { %1616 = vrot.lane.b32.xlu1 %v1614_v26, %s2662_s17 }
0x17e7   :  { %v1617_v27 = vpop.permute.xlu1 %1616 }
0x17e8   :  { %v1619_v28 = vadd.f32 %v1617_v27, %v1609_v25 }
0x17ea   :  { %2609 = vtanh.f32 %v1619_v28 }
0x17f4   :  { %v2610_v29 = vpop.eup %2609 }
0x17f5   :  { %1622 = vrot.lane.b32.xlu1 %v2610_v29, %s2661_s14 }
0x17f9   :  { %987 = vrot.lane.b32.xlu1 %v2914_v59, %s2662_s17  ;;  %v1312_v59 = vld [vmem:[#allocation3 + $0x20] sm:$0xff] }
0x17fd   :  { %1143 = vrot.lane.b32.xlu1 %v2947_v41, %s2662_s17 }
0x1801   :  { %1299 = vrot.lane.b32.xlu1 %v1297_v30, %s2662_s17 }
0x1867   :  { %v1623_v12 = vpop.permute.xlu1 %1622 }
0x1868   :  { %v1625_v31 = vmul.f32 %v2608_v22, %v1623_v12 }
0x186a   :  { %v1627_v32 = vpack.c.bf16 %v1625_v31, %v1625_v31 }
0x186b   :  { %v988_v33 = vpop.permute.xlu1 %987 }
0x186c   :  { %990 = vst.msk [vmem:[#allocation3 + $0x18] sm:$0xff] %vm679_vm3, %v988_v33  ;;  %1629 = vrot.lane.b32.xlu0 %v1627_v32, %s2662_s17 }
0x186f   :  { %v1144_v7 = vpop.permute.xlu1 %1143 }
0x1870   :  { %1146 = vst.msk [vmem:[#allocation3 + $0x28] sm:$0xff] %vm679_vm3, %v1144_v7 }
0x1873   :  { %v1300_v34 = vpop.permute.xlu1 %1299  ;;  %v1311_v36 = vld [vmem:[#allocation3 + $0x18] sm:$0xff] }
0x1874   :  { %1302 = vst.msk [vmem:[#allocation3 + $0x38] sm:$0xff] %vm679_vm3, %v1300_v34  ;;  %2425 = vmatmul.mubr.msk.f32.gmra.mrb[26].mxu0 %vm679_vm3, %v1311_v36 }
0x1875   :  { %2427 = vmatprep.mubr.msk.f32.mxu0 %vm679_vm3, %v1312_v59 }
0x1877   :  { %v1313_v41 = vld [vmem:[#allocation3 + $0x28] sm:$0xff] }
0x1878   :  { %2428 = vmatmul.mubr.msk.f32.gmra.mrb[28].mxu0 %vm679_vm3, %v1313_v41 }
0x1879   :  { %2430 = vmatprep.mubr.msk.f32.mxu0 %vm679_vm3, %v1314_v49 }
0x187b   :  { %v1315_v37 = vld [vmem:[#allocation3 + $0x38] sm:$0xff] }
0x187c   :  { %2431 = vmatmul.mubr.msk.f32.gmra.mrb[30].mxu0 %vm679_vm3, %v1315_v37 }
0x187d   :  { %2453 = vmatprep.mubr.msk.bf16.mxu0 %vm2660_vm2, %v2659_v0 }
0x18de   :  { %v1630_v18 = vpop.permute.xlu0 %1629 }
0x18df   :  { %2454 = vmatmul.mubr.msk.bf16.vlgmr.msra.gmra.mrb[32].mxu0 %vm679_vm3, %v1630_v18 }
0x18e0   :  { %2466 = vmatpush3.bf16.msra.mxu0 %v2989_v19  ;;  %2469 = vmatprep.mubr.msk.bf16.mxu0 %vm2660_vm2, %v2659_v0 }
0x18e1   :  { %2467 = vmatprep.subr.bf16.mxu0 %v2659_v0 }
0x18e4   :  { %2468 = vmatpush3.bf16.msra.mxu0 %v2997_v11 }
0x18e5   :  { %2481 = vmatprep.subr.bf16.mxu0 %v2659_v0 }
0x1947   :  { %v2426_v51 = vpop.f32.mrb[26].mxu0 }
0x1948   :  { %v1422_v38 = vpop.f32.mrb[27].mxu0  ;;  %v1428_v4 = vadd.f32 %v2426_v51, %v3029_v6 }
0x1949   :  { %v1423_v45 = vadd.f32 %v3029_v6, %v1422_v38 }
0x194b   :  { %v3089_v39 = vpop.f32.mrb[28].mxu0 }
0x194c   :  { %v3091_v40 = vpop.f32.mrb[29].mxu0 }
0x194d   :  { %v1433_v12 = vadd.f32 %v3029_v6, %v3091_v40 }
0x194f   :  { %v3093_v42 = vpop.f32.mrb[30].mxu0 }
0x1950   :  { %v3095_v44 = vpop.f32.mrb[31].mxu0 }
0x19b2   :  { %v1668_v46 = vpop.f32.mrb[32].mxu0 }
0x19b3   :  { %v1674_v48 = vadd.f32 %v1668_v46, %v1423_v45  ;;  %v2455_v50 = vpop.f32.mrb[33].mxu0 }
0x19b4   :  { %v1671_v52 = vpop.f32.mrb[34].mxu0 }
0x19b5   :  { %2611 = vtanh.f32 %v1674_v48  ;;  %v2456_v53 = vpop.f32.mrb[35].mxu0  ;;  %v2215_v47 = vmul.f32 -1.442695, %v1674_v48 }
0x19b7   :  { %2613 = vpow2.f32 %v2215_v47 }
0x19bf   :  { %v2612_v54 = vpop.eup %2611 }
0x19c0   :  { %1684 = vrot.lane.b32.xlu1 %v2612_v54, %s2661_s14  ;;  %v1438_v54 = vadd.f32 %v3089_v39, %v3029_v6 }
0x19c1   :  { %v2614_v55 = vpop.eup %2613 }
0x19c2   :  { %v1678_v56 = vadd.f32 1.0, %v2614_v55 }
0x19c4   :  { %2615 = vrcp.f32 %v1678_v56 }
0x19ce   :  { %v2616_v57 = vpop.eup %2615 }
0x19cf   :  { %v1682_v16 = vmul.f32 %v2616_v57, %v1619_v28 }
0x1a32   :  { %v1685_v58 = vpop.permute.xlu1 %1684 }
0x1a33   :  { %v1687_v60 = vmul.f32 %v2616_v57, %v1685_v58 }
0x1a35   :  { %1689 = vrot.lane.b32.xlu0 %v1687_v60, %s2662_s17 }
0x1aa7   :  { %v1690_v61 = vpop.permute.xlu0 %1689 }
0x1aa8   :  { %v1692_v63 = vadd.f32 %v1690_v61, %v1682_v16 }
0x1aaa   :  { %2617 = vtanh.f32 %v1692_v63 }
0x1ab4   :  { %v2618_v1 = vpop.eup %2617 }
0x1ab5   :  { %1695 = vrot.lane.b32.xlu1 %v2618_v1, %s2661_s14 }
0x1b27   :  { %v1696_v2 = vpop.permute.xlu1 %1695 }
0x1b28   :  { %v1698_v3 = vmul.f32 %v2616_v57, %v1696_v2 }
0x1b2a   :  { %v1700_v62 = vpack.c.bf16 %v1698_v3, %v1698_v3 }
0x1b2c   :  { %1702 = vrot.lane.b32.xlu0 %v1700_v62, %s2662_s17 }
0x1b9e   :  { %v1703_v43 = vpop.permute.xlu0 %1702 }
0x1b9f   :  { %2462 = vmatmul.mubr.msk.bf16.vlgmr.msra.gmra.mrb[32].mxu1 %vm679_vm3, %v1703_v43 }
0x1ba0   :  { %2474 = vmatpush3.bf16.msra.mxu1 %v2989_v19  ;;  %2477 = vmatprep.mubr.msk.bf16.mxu1 %vm2660_vm2, %v2659_v0 }
0x1ba1   :  { %2475 = vmatprep.subr.bf16.mxu1 %v2659_v0 }
0x1ba4   :  { %2476 = vmatpush3.bf16.msra.mxu1 %v2997_v11 }
0x1ba5   :  { %2489 = vmatprep.subr.bf16.mxu1 %v2659_v0 }
0x1c72   :  { %v1741_v5 = vpop.f32.mrb[32].mxu1 }
0x1c73   :  { %v1747_v8 = vadd.f32 %v1741_v5, %v1428_v4  ;;  %v2463_v35 = vpop.f32.mrb[33].mxu1 }
0x1c74   :  { %v1744_v23 = vpop.f32.mrb[34].mxu1  ;;  %v1443_v35 = vadd.f32 %v3029_v6, %v3095_v44 }
0x1c75   :  { %2619 = vtanh.f32 %v1747_v8  ;;  %v2464_v9 = vpop.f32.mrb[35].mxu1  ;;  %v2217_v13 = vmul.f32 -1.442695, %v1747_v8 }
0x1c77   :  { %2621 = vpow2.f32 %v2217_v13 }
0x1c7f   :  { %v2620_v10 = vpop.eup %2619 }
0x1c80   :  { %1757 = vrot.lane.b32.xlu1 %v2620_v10, %s2661_s14 }
0x1c81   :  { %v2622_v15 = vpop.eup %2621 }
0x1c82   :  { %v1751_v17 = vadd.f32 1.0, %v2622_v15 }
0x1c84   :  { %2623 = vrcp.f32 %v1751_v17 }
0x1c8e   :  { %v2624_v14 = vpop.eup %2623 }
0x1c8f   :  { %v1755_v22 = vmul.f32 %v2624_v14, %v1692_v63 }
0x1cf2   :  { %v1758_v20 = vpop.permute.xlu1 %1757 }
0x1cf3   :  { %v1760_v21 = vmul.f32 %v2624_v14, %v1758_v20 }
0x1cf5   :  { %1762 = vrot.lane.b32.xlu0 %v1760_v21, %s2662_s17 }
0x1d67   :  { %v1763_v24 = vpop.permute.xlu0 %1762 }
0x1d68   :  { %v1765_v26 = vadd.f32 %v1763_v24, %v1755_v22 }
0x1d6a   :  { %2625 = vtanh.f32 %v1765_v26 }
0x1d74   :  { %v2626_v25 = vpop.eup %2625 }
0x1d75   :  { %1768 = vrot.lane.b32.xlu1 %v2626_v25, %s2661_s14 }
0x1de7   :  { %v1769_v27 = vpop.permute.xlu1 %1768 }
0x1de8   :  { %v1771_v28 = vmul.f32 %v2624_v14, %v1769_v27 }
0x1dea   :  { %v1773_v29 = vpack.c.bf16 %v1771_v28, %v1771_v28 }
0x1dec   :  { %1775 = vrot.lane.b32.xlu0 %v1773_v29, %s2662_s17 }
0x1e5e   :  { %v1776_v30 = vpop.permute.xlu0 %1775 }
0x1e5f   :  { %2470 = vmatmul.mubr.msk.bf16.vlgmr.msra.gmra.mrb[36].mxu0 %vm679_vm3, %v1776_v30 }
0x1e60   :  { %2482 = vmatpush3.bf16.msra.mxu0 %v2989_v19  ;;  %2485 = vmatprep.mubr.msk.bf16.mxu0 %vm2660_vm2, %v2659_v0 }
0x1e61   :  { %2483 = vmatprep.subr.bf16.mxu0 %v2659_v0 }
0x1e64   :  { %2484 = vmatpush3.bf16.msra.mxu0 %v2997_v11 }
0x1f32   :  { %v1814_v31 = vpop.f32.mrb[36].mxu0 }
0x1f33   :  { %v1820_v32 = vadd.f32 %v1814_v31, %v1433_v12  ;;  %v2471_v33 = vpop.f32.mrb[37].mxu0  ;;  %v1448_v31 = vadd.f32 %v3093_v42, %v3029_v6 }
0x1f34   :  { %v1817_v7 = vpop.f32.mrb[38].mxu0 }
0x1f35   :  { %2627 = vtanh.f32 %v1820_v32  ;;  %v2472_v34 = vpop.f32.mrb[39].mxu0  ;;  %v2219_v59 = vmul.f32 -1.442695, %v1820_v32 }
0x1f37   :  { %2629 = vpow2.f32 %v2219_v59 }
0x1f3f   :  { %v2628_v36 = vpop.eup %2627 }
0x1f40   :  { %1830 = vrot.lane.b32.xlu1 %v2628_v36, %s2661_s14 }
0x1f41   :  { %v2630_v41 = vpop.eup %2629 }
0x1f42   :  { %v1824_v49 = vadd.f32 1.0, %v2630_v41 }
0x1f44   :  { %2631 = vrcp.f32 %v1824_v49 }
0x1f4e   :  { %v2632_v37 = vpop.eup %2631 }
0x1f4f   :  { %v1828_v38 = vmul.f32 %v2632_v37, %v1765_v26 }
0x1fb2   :  { %v1831_v18 = vpop.permute.xlu1 %1830 }
0x1fb3   :  { %v1833_v51 = vmul.f32 %v2632_v37, %v1831_v18 }
0x1fb5   :  { %1835 = vrot.lane.b32.xlu0 %v1833_v51, %s2662_s17 }
0x2027   :  { %v1836_v40 = vpop.permute.xlu0 %1835 }
0x2028   :  { %v1838_v45 = vadd.f32 %v1836_v40, %v1828_v38 }
0x202a   :  { %2633 = vtanh.f32 %v1838_v45 }
0x2034   :  { %v2634_v46 = vpop.eup %2633 }
0x2035   :  { %1841 = vrot.lane.b32.xlu1 %v2634_v46, %s2661_s14  ;;  %v2064_v46 = vld [vmem:[%s3182_s7] sm:$0xff] }
0x20a7   :  { %v1842_v48 = vpop.permute.xlu1 %1841 }
0x20a8   :  { %v1844_v50 = vmul.f32 %v2632_v37, %v1842_v48  ;;  %v2065_v48 = vld [vmem:[%s3182_s7 + $0x8] sm:$0xff] }
0x20aa   :  { %v1846_v52 = vpack.c.bf16 %v1844_v50, %v1844_v50  ;;  %v2066_v50 = vld [vmem:[%s3182_s7 + $0x10] sm:$0xff] }
0x20ac   :  { %1848 = vrot.lane.b32.xlu0 %v1846_v52, %s2662_s17  ;;  %v2517_v52 = vpack.c.bf16 %v2065_v48, %v2064_v46 }
0x211e   :  { %v1849_v53 = vpop.permute.xlu0 %1848 }
0x211f   :  { %2478 = vmatmul.mubr.msk.bf16.vlgmr.msra.gmra.mrb[36].mxu1 %vm679_vm3, %v1849_v53  ;;  %v2067_v53 = vld [vmem:[%s3182_s7 + $0x18] sm:$0xff] }
0x2120   :  { %2490 = vmatpush3.bf16.msra.mxu1 %v2989_v19  ;;  %2493 = vmatprep.mubr.msk.bf16.mxu1 %vm2660_vm2, %v2659_v0 }
0x2121   :  { %2491 = vmatprep.subr.bf16.mxu1 %v2659_v0 }
0x2124   :  { %2492 = vmatpush3.bf16.msra.mxu1 %v2997_v11 }
0x21f2   :  { %v1887_v47 = vpop.f32.mrb[36].mxu1 }
0x21f3   :  { %v1893_v55 = vadd.f32 %v1887_v47, %v1438_v54  ;;  %v2479_v56 = vpop.f32.mrb[37].mxu1  ;;  %v2520_v54 = vpack.c.bf16 %v2067_v53, %v2066_v50 }
0x21f4   :  { %v1890_v57 = vpop.f32.mrb[38].mxu1 }
0x21f5   :  { %2635 = vtanh.f32 %v1893_v55  ;;  %v2480_v58 = vpop.f32.mrb[39].mxu1  ;;  %v2221_v19 = vmul.f32 -1.442695, %v1893_v55 }
0x21f6   :  { %v2226_v58 = vld [vmem:[%s3183_s8] ss:$0 sm:$0xff] }
0x21f7   :  { %2637 = vpow2.f32 %v2221_v19 }
0x21ff   :  { %v2636_v60 = vpop.eup %2635 }
0x2200   :  { %1903 = vrot.lane.b32.xlu1 %v2636_v60, %s2661_s14 }
0x2201   :  { %v2638_v16 = vpop.eup %2637 }
0x2202   :  { %v1897_v61 = vadd.f32 1.0, %v2638_v16 }
0x2204   :  { %2639 = vrcp.f32 %v1897_v61 }
0x220e   :  { %v2640_v63 = vpop.eup %2639 }
0x220f   :  { %v1901_v39 = vmul.f32 %v2640_v63, %v1838_v45  ;;  %v2663_v45 = vmov 0.0|0.0  }
0x2210   :  { %2516 = vmatprep.subr.bf16.mxu0 %v2663_v45 }
0x2272   :  { %v1904_v1 = vpop.permute.xlu1 %1903 }
0x2273   :  { %v1906_v11 = vmul.f32 %v2640_v63, %v1904_v1 }
0x2275   :  { %1908 = vrot.lane.b32.xlu0 %v1906_v11, %s2662_s17 }
0x22e7   :  { %v1909_v2 = vpop.permute.xlu0 %1908 }
0x22e8   :  { %v1911_v3 = vadd.f32 %v1909_v2, %v1901_v39 }
0x22ea   :  { %2641 = vtanh.f32 %v1911_v3 }
0x22f4   :  { %v2642_v62 = vpop.eup %2641 }
0x22f5   :  { %1914 = vrot.lane.b32.xlu1 %v2642_v62, %s2661_s14 }
0x2367   :  { %v1915_v43 = vpop.permute.xlu1 %1914 }
0x2368   :  { %v1917_v4 = vmul.f32 %v2640_v63, %v1915_v43 }
0x236a   :  { %v1919_v5 = vpack.c.bf16 %v1917_v4, %v1917_v4 }
0x236c   :  { %1921 = vrot.lane.b32.xlu0 %v1919_v5, %s2662_s17 }
0x23de   :  { %v1922_v8 = vpop.permute.xlu0 %1921 }
0x23df   :  { %2486 = vmatmul.mubr.msk.bf16.vlgmr.msra.gmra.mrb[40].mxu0 %vm679_vm3, %v1922_v8 }
0x23e0   :  { %2505 = vmatprep.mubr.msk.f32.mxu0 %vm2660_vm2, %v2659_v0  ;;  %2518 = vmatpush3.bf16.msra.mxu0 %v2517_v52 }
0x23e1   :  { %2519 = vmatprep.subr.bf16.mxu0 %v2663_v45 }
0x23e4   :  { %2521 = vmatpush3.bf16.msra.mxu0 %v2520_v54 }
0x24b2   :  { %v1960_v23 = vpop.f32.mrb[40].mxu0 }
0x24b3   :  { %v1966_v9 = vadd.f32 %v1960_v23, %v1443_v35  ;;  %v2487_v10 = vpop.f32.mrb[41].mxu0 }
0x24b4   :  { %v1963_v13 = vpop.f32.mrb[42].mxu0 }
0x24b5   :  { %2643 = vtanh.f32 %v1966_v9  ;;  %v2488_v15 = vpop.f32.mrb[43].mxu0  ;;  %v2223_v14 = vmul.f32 -1.442695, %v1966_v9 }
0x24b7   :  { %2645 = vpow2.f32 %v2223_v14 }
0x24bf   :  { %v2644_v17 = vpop.eup %2643 }
0x24c0   :  { %1976 = vrot.lane.b32.xlu1 %v2644_v17, %s2661_s14 }
0x24c1   :  { %v2646_v20 = vpop.eup %2645 }
0x24c2   :  { %v1970_v21 = vadd.f32 1.0, %v2646_v20 }
0x24c4   :  { %2647 = vrcp.f32 %v1970_v21 }
0x24ce   :  { %v2648_v22 = vpop.eup %2647 }
0x24cf   :  { %v1974_v44 = vmul.f32 %v2648_v22, %v1911_v3 }
0x2532   :  { %v1977_v24 = vpop.permute.xlu1 %1976 }
0x2533   :  { %v1979_v0 = vmul.f32 %v2648_v22, %v1977_v24 }
0x2535   :  { %1981 = vrot.lane.b32.xlu0 %v1979_v0, %s2662_s17 }
0x25a7   :  { %v1982_v26 = vpop.permute.xlu0 %1981 }
0x25a8   :  { %v1984_v25 = vadd.f32 %v1982_v26, %v1974_v44 }
0x25aa   :  { %2649 = vtanh.f32 %v1984_v25 }
0x25b4   :  { %v2650_v27 = vpop.eup %2649 }
0x25b5   :  { %1987 = vrot.lane.b32.xlu1 %v2650_v27, %s2661_s14 }
0x2627   :  { %v1988_v28 = vpop.permute.xlu1 %1987 }
0x2628   :  { %v1990_v29 = vmul.f32 %v2648_v22, %v1988_v28 }
0x262a   :  { %v1992_v30 = vpack.c.bf16 %v1990_v29, %v1990_v29 }
0x262c   :  { %1994 = vrot.lane.b32.xlu0 %v1992_v30, %s2662_s17 }
0x269e   :  { %v1995_v12 = vpop.permute.xlu0 %1994 }
0x269f   :  { %2494 = vmatmul.mubr.msk.bf16.vlgmr.msra.gmra.mrb[40].mxu1 %vm679_vm3, %v1995_v12 }
0x2772   :  { %v2033_v32 = vpop.f32.mrb[40].mxu1 }
0x2773   :  { %v2039_v33 = vadd.f32 %v2033_v32, %v1448_v31  ;;  %v2495_v7 = vpop.f32.mrb[41].mxu1 }
0x2774   :  { %v2036_v34 = vpop.f32.mrb[42].mxu1 }
0x2775   :  { %2651 = vtanh.f32 %v2039_v33  ;;  %v2496_v36 = vpop.f32.mrb[43].mxu1  ;;  %v2225_v41 = vmul.f32 -1.442695, %v2039_v33 }
0x2777   :  { %2653 = vpow2.f32 %v2225_v41 }
0x277f   :  { %v2652_v59 = vpop.eup %2651 }
0x2780   :  { %2049 = vrot.lane.b32.xlu1 %v2652_v59, %s2661_s14 }
0x2781   :  { %v2654_v49 = vpop.eup %2653 }
0x2782   :  { %v2043_v37 = vadd.f32 1.0, %v2654_v49 }
0x2784   :  { %2655 = vrcp.f32 %v2043_v37 }
0x278e   :  { %v2656_v18 = vpop.eup %2655 }
0x278f   :  { %v2047_v6 = vmul.f32 %v2656_v18, %v1984_v25 }
0x27f2   :  { %v2050_v51 = vpop.permute.xlu1 %2049 }
0x27f3   :  { %v2052_v38 = vmul.f32 %v2656_v18, %v2050_v51 }
0x27f5   :  { %2054 = vrot.lane.b32.xlu0 %v2052_v38, %s2662_s17 }
0x2867   :  { %v2055_v42 = vpop.permute.xlu0 %2054 }
0x2868   :  { %v2057_v40 = vadd.f32 %v2055_v42, %v2047_v6 }
0x286a   :  { %2657 = vtanh.f32 %v2057_v40 }
0x2874   :  { %v2658_v47 = vpop.eup %2657 }
0x2875   :  { %2060 = vrot.lane.b32.xlu1 %v2658_v47, %s2661_s14 }
0x28e7   :  { %v2061_v55 = vpop.permute.xlu1 %2060 }
0x28e8   :  { %v2063_v56 = vmul.f32 %v2656_v18, %v2061_v55 }
0x28ea   :  { %2076 = vrot.lane.b32.xlu0 %v2063_v56, %s2662_s17 }
0x295c   :  { %v2077_v57 = vpop.permute.xlu0 %2076 }
0x295d   :  { %2506 = vmatmul.mubr.msk.f32.vlgmr.msra.gmra.mrb[44].mxu0 %vm679_vm3, %v2077_v57 }
0x2a30   :  { %v2146_v60 = vpop.f32.mrb[44].mxu0 }
0x2a31   :  { %v2147_v19 = vadd.f32 %v2226_v58, %v2146_v60  ;;  %v2507_v16 = vpop.f32.mrb[45].mxu0 }
0x2a33   :  { %2150 = vst [vmem:[%s3184_s11] sm:$0xff] %v2147_v19 }

</bundles_post_ra>
